<compile_context>
chip_gen: v7x
topology: tpu7x:2x2x1
jax: 0.10.0
libtpu: 0.0.40
codegen_flags: <defaults>
</compile_context>

<pallas_src>
import functools

import jax
import jax.numpy as jnp
from jax import lax
from jax.experimental import pallas as pl
from jax.experimental.pallas import tpu as pltpu


# ----------------------------- Pallas kernel --------------------------------
def _lstm_recurrent_kernel(pg_ref, whh_ref, out_ref, hn_ref, cn_ref,
                           h_sc, c_sc):
    """Fused-direction LSTM recurrence over one block of Tc time steps.

    Grid axis 0 = time blocks (sequential, "arbitrary").
      pg_ref  : (Tc, D, B, 4H) f32  pre-gates = x @ W_ih^T + b_ih + b_hh
                                    (backward direction already time-reversed)
      whh_ref : (D, H, 4H)     bf16 hidden->gates weights (resident)
      out_ref : (Tc, D, B, H)  f32  per-step hidden outputs
                                    (backward dir in kernel-time order)
      hn_ref  : (D, B, H)      f32  final hidden state (resident)
      cn_ref  : (D, B, H)      f32  final cell state   (resident)
      h_sc/c_sc : VMEM (D, B, H) f32 recurrent state carried across blocks
    """
    blk = pl.program_id(0)

    @pl.when(blk == 0)
    def _():
        h_sc[...] = jnp.zeros_like(h_sc)
        c_sc[...] = jnp.zeros_like(c_sc)

    tc = pg_ref.shape[0]
    H = h_sc.shape[-1]
    whh = whh_ref[...]                       # load once per block (D, H, 4H)

    def step(j, carry):
        h, c = carry                         # (D, B, H) f32
        # Recurrent projection on the MXU: bf16 operands, f32 accumulation.
        rec = jnp.einsum('dbh,dhg->dbg', h.astype(jnp.bfloat16), whh,
                         preferred_element_type=jnp.float32)
        gates = pg_ref[j] + rec              # (D, B, 4H) f32

        # PyTorch gate order: input, forget, cell(g), output.  All gate math
        # stays in f32 on the VPU/EUP (v5e has no bf16 VPU/EUP path).
        i_g = jax.nn.sigmoid(gates[..., 0 * H:1 * H])
        f_g = jax.nn.sigmoid(gates[..., 1 * H:2 * H])
        g_g = jnp.tanh(gates[..., 2 * H:3 * H])
        o_g = jax.nn.sigmoid(gates[..., 3 * H:4 * H])

        c_new = f_g * c + i_g * g_g
        h_new = o_g * jnp.tanh(c_new)
        out_ref[j] = h_new
        return h_new, c_new

    h_fin, c_fin = lax.fori_loop(0, tc, step, (h_sc[...], c_sc[...]),
                                 unroll=True)
    h_sc[...] = h_fin
    c_sc[...] = c_fin

    @pl.when(blk == pl.num_programs(0) - 1)
    def _():
        hn_ref[...] = h_sc[...]
        cn_ref[...] = c_sc[...]


def _pick_time_block(T):
    """Largest time-block <= 32 that divides T (1 always works)."""
    for cand in (32, 16, 8, 4, 2, 1):
        if T % cand == 0:
            return cand
    return 1


def lstm_layer_fused(pregates, w_hh_stack):
    """Run one LSTM layer (both directions fused) over the full sequence.

    pregates   : (T, D, B, 4H) f32  (bwd direction pre-reversed in time)
    w_hh_stack : (D, H, 4H)    bf16
    returns (out (T, D, B, H), h_n (D, B, H), c_n (D, B, H)), all f32.
    """
    T, D, B, G = pregates.shape
    H = G // 4
    Tc = _pick_time_block(T)

    grid_spec = pltpu.PrefetchScalarGridSpec(
        num_scalar_prefetch=0,
        grid=(T // Tc,),
        in_specs=[
            pl.BlockSpec((Tc, D, B, G), lambda i: (i, 0, 0, 0)),   # pre-gates
            pl.BlockSpec((D, H, G), lambda i: (0, 0, 0)),          # W_hh (resident)
        ],
        out_specs=[
            pl.BlockSpec((Tc, D, B, H), lambda i: (i, 0, 0, 0)),   # outputs
            pl.BlockSpec((D, B, H), lambda i: (0, 0, 0)),          # h_N (resident)
            pl.BlockSpec((D, B, H), lambda i: (0, 0, 0)),          # c_N (resident)
        ],
        scratch_shapes=[
            pltpu.VMEM((D, B, H), jnp.float32),                    # h state
            pltpu.VMEM((D, B, H), jnp.float32),                    # c state
        ],
    )

    out_shapes = (
        jax.ShapeDtypeStruct((T, D, B, H), jnp.float32),
        jax.ShapeDtypeStruct((D, B, H), jnp.float32),
        jax.ShapeDtypeStruct((D, B, H), jnp.float32),
    )

    return pl.pallas_call(
        _lstm_recurrent_kernel,
        out_shape=out_shapes,
        grid_spec=grid_spec,
        compiler_params=pltpu.CompilerParams(
            dimension_semantics=("arbitrary",)),   # time is a sequential carry
    )(pregates, w_hh_stack)


# --------------------------- parameter building ------------------------------
def init_encoder_params(key, input_dim, emb_dim, hid_dim, n_layers,
                        bidirectional):
    num_dir = 2 if bidirectional else 1
    params = {}
    key, ek = jax.random.split(key)
    # nn.Embedding default init: N(0, 1)
    params["embedding"] = jax.random.normal(ek, (input_dim, emb_dim),
                                            dtype=jnp.float32)
    k = 1.0 / jnp.sqrt(hid_dim)
    lstm = {}
    for layer in range(n_layers):
        in_size = emb_dim if layer == 0 else hid_dim * num_dir
        for d in range(num_dir):
            key, k1, k2, k3, k4 = jax.random.split(key, 5)
            w_ih = jax.random.uniform(k1, (4 * hid_dim, in_size),
                                      minval=-k, maxval=k, dtype=jnp.float32)
            w_hh = jax.random.uniform(k2, (4 * hid_dim, hid_dim),
                                      minval=-k, maxval=k, dtype=jnp.float32)
            b_ih = jax.random.uniform(k3, (4 * hid_dim,),
                                      minval=-k, maxval=k, dtype=jnp.float32)
            b_hh = jax.random.uniform(k4, (4 * hid_dim,),
                                      minval=-k, maxval=k, dtype=jnp.float32)
            lstm[(layer, d)] = {
                # bf16 MXU operands, transposed to (in, 4H) / (H, 4H)
                "w_ih_t": w_ih.T.astype(jnp.bfloat16),
                "w_hh_t": w_hh.T.astype(jnp.bfloat16),
                "bias": (b_ih + b_hh).astype(jnp.float32),         # (4H,)
            }
    params["lstm"] = lstm
    return params


# ------------------------------ forward pass ---------------------------------
def encoder_forward(params, src, *, n_layers, bidirectional):
    """src: (T, B) int32 token ids. Returns (outputs, hidden, cell)."""
    num_dir = 2 if bidirectional else 1

    embedded = jnp.take(params["embedding"], src, axis=0)   # (T, B, E)
    x = embedded                                            # dropout: eval-mode identity

    h_finals, c_finals = [], []
    for layer in range(n_layers):
        # Hoisted input projection: one big bf16 matmul per direction for the
        # whole sequence -> pre-gates (T, B, 4H), bias folded in.
        pgs, whhs = [], []
        for d in range(num_dir):
            p = params["lstm"][(layer, d)]
            pg = jnp.einsum('tbe,eg->tbg',
                            x.astype(jnp.bfloat16), p["w_ih_t"],
                            preferred_element_type=jnp.float32) + p["bias"]
            if d == 1:
                pg = pg[::-1]          # feed the bwd direction in reverse time
            pgs.append(pg)
            whhs.append(p["w_hh_t"])

        pregates = jnp.stack(pgs, axis=1)                   # (T, D, B, 4H)
        w_hh_stack = jnp.stack(whhs, axis=0)                # (D, H, 4H)

        out, h_n, c_n = lstm_layer_fused(pregates, w_hh_stack)

        if num_dir == 2:
            # out[:, 1] is in reversed (kernel) time order -> flip back.
            x = jnp.concatenate([out[:, 0], out[::-1, 1]], axis=-1)
        else:
            x = out[:, 0]

        for d in range(num_dir):
            h_finals.append(h_n[d])
            c_finals.append(c_n[d])
        # inter-layer LSTM dropout: eval-mode identity

    outputs = x                                             # (T, B, num_dir*H)
    hidden = jnp.stack(h_finals, axis=0)                    # (L*num_dir, B, H)
    cell = jnp.stack(c_finals, axis=0)                      # (L*num_dir, B, H)
    return outputs, hidden, cell


# ---------------------------------- main --------------------------------------
if __name__ == "__main__":
    INPUT_DIM = 16      # vocab size
    EMB_DIM = 32
    HID_DIM = 32
    N_LAYERS = 2
    DROPOUT = 0.1       # identity at inference
    BIDIRECTIONAL = True
    SEQ_LEN = 8
    BATCH = 2

    key = jax.random.PRNGKey(0)
    key, pkey, skey = jax.random.split(key, 3)

    params = init_encoder_params(pkey, INPUT_DIM, EMB_DIM, HID_DIM,
                                 N_LAYERS, BIDIRECTIONAL)
    src = jax.random.randint(skey, (SEQ_LEN, BATCH), 0, INPUT_DIM,
                             dtype=jnp.int32)

    fwd = jax.jit(functools.partial(encoder_forward, n_layers=N_LAYERS,
                                    bidirectional=BIDIRECTIONAL))
    outputs, hidden, cell = fwd(params, src)
    jax.block_until_ready((outputs, hidden, cell))

    num_dir = 2 if BIDIRECTIONAL else 1
    assert outputs.shape == (SEQ_LEN, BATCH, num_dir * HID_DIM)
    assert hidden.shape == (N_LAYERS * num_dir, BATCH, HID_DIM)
    assert cell.shape == (N_LAYERS * num_dir, BATCH, HID_DIM)

    print("KERNEL_OK")
</pallas_src>

<mosaic_0001>
module attributes {stable_mosaic.version = 11 : i64} {
  func.func @_lstm_recurrent_kernel(%arg0: i32, %arg1: memref<8x2x2x128xf32, #tpu.memory_space<vmem>>, %arg2: memref<2x32x128xbf16, #tpu.memory_space<vmem>>, %arg3: memref<8x2x2x32xf32, #tpu.memory_space<vmem>>, %arg4: memref<2x2x32xf32, #tpu.memory_space<vmem>>, %arg5: memref<2x2x32xf32, #tpu.memory_space<vmem>>, %arg6: memref<2x2x32xf32, #tpu.memory_space<vmem>>, %arg7: memref<2x2x32xf32, #tpu.memory_space<vmem>>) attributes {dimension_semantics = [#tpu.dimension_semantics<arbitrary>], iteration_bounds = array<i64: 1>, scalar_prefetch = 0 : i64, scratch_operands = 2 : i64, tpu.core_type = #tpu.core_type<tc>, window_params = [{transform_indices = @transform_0, window_bounds = array<i64: 8, 2, 2, 128>}, {pipeline_mode = #tpu.pipeline_mode<synchronous>, transform_indices = @transform_1, window_bounds = array<i64: 2, 32, 128>}, {transform_indices = @transform_2, window_bounds = array<i64: 8, 2, 2, 32>}, {pipeline_mode = #tpu.pipeline_mode<synchronous>, transform_indices = @transform_3, window_bounds = array<i64: 2, 2, 32>}, {pipeline_mode = #tpu.pipeline_mode<synchronous>, transform_indices = @transform_4, window_bounds = array<i64: 2, 2, 32>}]} {
    %c0_i32 = arith.constant 0 : i32
    %0 = arith.cmpi eq, %arg0, %c0_i32 : i32
    %1 = arith.extui %0 : i1 to i32
    %c0_i32_0 = arith.constant 0 : i32
    %2 = arith.cmpi ne, %1, %c0_i32_0 : i32
    scf.if %2 {
      %cst_97 = arith.constant 0.000000e+00 : f32
      %291 = vector.broadcast %cst_97 : f32 to vector<2x2x32xf32>
      %c0_98 = arith.constant 0 : index
      %c0_99 = arith.constant 0 : index
      %c0_100 = arith.constant 0 : index
      %292 = vector.load %arg6[%c0_98, %c0_99, %c0_100] : memref<2x2x32xf32, #tpu.memory_space<vmem>>, vector<2x2x32xf32>
      tpu.vector_store %arg6[%c0_98, %c0_99, %c0_100], %291 {strides = array<i32>} : memref<2x2x32xf32, #tpu.memory_space<vmem>>, vector<2x2x32xf32>,
      %cst_101 = arith.constant 0.000000e+00 : f32
      %293 = vector.broadcast %cst_101 : f32 to vector<2x2x32xf32>
      %c0_102 = arith.constant 0 : index
      %c0_103 = arith.constant 0 : index
      %c0_104 = arith.constant 0 : index
      %294 = vector.load %arg7[%c0_102, %c0_103, %c0_104] : memref<2x2x32xf32, #tpu.memory_space<vmem>>, vector<2x2x32xf32>
      tpu.vector_store %arg7[%c0_102, %c0_103, %c0_104], %293 {strides = array<i32>} : memref<2x2x32xf32, #tpu.memory_space<vmem>>, vector<2x2x32xf32>,
    } else {
    }
    %c0 = arith.constant 0 : index
    %c0_1 = arith.constant 0 : index
    %c0_2 = arith.constant 0 : index
    %3 = vector.load %arg2[%c0, %c0_1, %c0_2] : memref<2x32x128xbf16, #tpu.memory_space<vmem>>, vector<2x32x128xbf16>
    %c0_3 = arith.constant 0 : index
    %c0_4 = arith.constant 0 : index
    %c0_5 = arith.constant 0 : index
    %4 = vector.load %arg6[%c0_3, %c0_4, %c0_5] : memref<2x2x32xf32, #tpu.memory_space<vmem>>, vector<2x2x32xf32>
    %c0_6 = arith.constant 0 : index
    %c0_7 = arith.constant 0 : index
    %c0_8 = arith.constant 0 : index
    %5 = vector.load %arg7[%c0_6, %c0_7, %c0_8] : memref<2x2x32xf32, #tpu.memory_space<vmem>>, vector<2x2x32xf32>
    %c0_i32_9 = arith.constant 0 : i32
    %6 = arith.truncf %4 : vector<2x2x32xf32> to vector<2x2x32xbf16>
    "tpu.trace_start"() <{level = 10 : i32, message = "dbh,dhg->dbg"}> : () -> ()
    %cst = arith.constant dense<0.000000e+00> : vector<2x2x128xf32>
    %7 = tpu.matmul %6, %3, %cst {dimension_numbers = #tpu.dot_dimension_numbers<[2], [1], [1], [2], [0, 0, 0, 1, 1, 2], [0], [0]>} : vector<2x2x32xbf16>, vector<2x32x128xbf16>, vector<2x2x128xf32> -> vector<2x2x128xf32>
    "tpu.trace_stop"() : () -> ()
    %8 = arith.index_cast %c0_i32_9 : i32 to index
    %c0_10 = arith.constant 0 : index
    %c0_11 = arith.constant 0 : index
    %c0_12 = arith.constant 0 : index
    %9 = vector.load %arg1[%8, %c0_10, %c0_11, %c0_12] : memref<8x2x2x128xf32, #tpu.memory_space<vmem>>, vector<1x2x2x128xf32>
    %10 = vector.shape_cast %9 : vector<1x2x2x128xf32> to vector<2x2x128xf32>
    %11 = arith.addf %10, %7 : vector<2x2x128xf32>
    %12 = vector.extract_strided_slice %11 {offsets = [0, 0, 0], sizes = [2, 2, 32], strides = [1, 1, 1]} : vector<2x2x128xf32> to vector<2x2x32xf32>
    %13 = arith.negf %12 : vector<2x2x32xf32>
    %14 = math.exp %13 : vector<2x2x32xf32>
    %cst_13 = arith.constant 1.000000e+00 : f32
    %15 = vector.broadcast %cst_13 : f32 to vector<2x2x32xf32>
    %16 = arith.addf %15, %14 : vector<2x2x32xf32>
    %17 = arith.divf %15, %16 : vector<2x2x32xf32>
    %18 = vector.extract_strided_slice %11 {offsets = [0, 0, 32], sizes = [2, 2, 32], strides = [1, 1, 1]} : vector<2x2x128xf32> to vector<2x2x32xf32>
    %19 = arith.negf %18 : vector<2x2x32xf32>
    %20 = math.exp %19 : vector<2x2x32xf32>
    %cst_14 = arith.constant 1.000000e+00 : f32
    %21 = vector.broadcast %cst_14 : f32 to vector<2x2x32xf32>
    %22 = arith.addf %21, %20 : vector<2x2x32xf32>
    %23 = arith.divf %21, %22 : vector<2x2x32xf32>
    %24 = vector.extract_strided_slice %11 {offsets = [0, 0, 64], sizes = [2, 2, 32], strides = [1, 1, 1]} : vector<2x2x128xf32> to vector<2x2x32xf32>
    %25 = math.tanh %24 : vector<2x2x32xf32>
    %26 = vector.extract_strided_slice %11 {offsets = [0, 0, 96], sizes = [2, 2, 32], strides = [1, 1, 1]} : vector<2x2x128xf32> to vector<2x2x32xf32>
    %27 = arith.negf %26 : vector<2x2x32xf32>
    %28 = math.exp %27 : vector<2x2x32xf32>
    %cst_15 = arith.constant 1.000000e+00 : f32
    %29 = vector.broadcast %cst_15 : f32 to vector<2x2x32xf32>
    %30 = arith.addf %29, %28 : vector<2x2x32xf32>
    %31 = arith.divf %29, %30 : vector<2x2x32xf32>
    %32 = arith.mulf %23, %5 : vector<2x2x32xf32>
    %33 = arith.mulf %17, %25 : vector<2x2x32xf32>
    %34 = arith.addf %32, %33 : vector<2x2x32xf32>
    %35 = math.tanh %34 : vector<2x2x32xf32>
    %36 = arith.mulf %31, %35 : vector<2x2x32xf32>
    %37 = arith.index_cast %c0_i32_9 : i32 to index
    %c0_16 = arith.constant 0 : index
    %c0_17 = arith.constant 0 : index
    %c0_18 = arith.constant 0 : index
    %38 = vector.load %arg3[%37, %c0_16, %c0_17, %c0_18] : memref<8x2x2x32xf32, #tpu.memory_space<vmem>>, vector<1x2x2x32xf32>
    %39 = vector.shape_cast %38 : vector<1x2x2x32xf32> to vector<2x2x32xf32>
    %40 = vector.shape_cast %36 : vector<2x2x32xf32> to vector<1x2x2x32xf32>
    tpu.vector_store %arg3[%37, %c0_16, %c0_17, %c0_18], %40 {strides = array<i32>} : memref<8x2x2x32xf32, #tpu.memory_space<vmem>>, vector<1x2x2x32xf32>,
    %c1_i32 = arith.constant 1 : i32
    %41 = arith.truncf %36 : vector<2x2x32xf32> to vector<2x2x32xbf16>
    "tpu.trace_start"() <{level = 10 : i32, message = "dbh,dhg->dbg"}> : () -> ()
    %cst_19 = arith.constant dense<0.000000e+00> : vector<2x2x128xf32>
    %42 = tpu.matmul %41, %3, %cst_19 {dimension_numbers = #tpu.dot_dimension_numbers<[2], [1], [1], [2], [0, 0, 0, 1, 1, 2], [0], [0]>} : vector<2x2x32xbf16>, vector<2x32x128xbf16>, vector<2x2x128xf32> -> vector<2x2x128xf32>
    "tpu.trace_stop"() : () -> ()
    %43 = arith.index_cast %c1_i32 : i32 to index
    %c0_20 = arith.constant 0 : index
    %c0_21 = arith.constant 0 : index
    %c0_22 = arith.constant 0 : index
    %44 = vector.load %arg1[%43, %c0_20, %c0_21, %c0_22] : memref<8x2x2x128xf32, #tpu.memory_space<vmem>>, vector<1x2x2x128xf32>
    %45 = vector.shape_cast %44 : vector<1x2x2x128xf32> to vector<2x2x128xf32>
    %46 = arith.addf %45, %42 : vector<2x2x128xf32>
    %47 = vector.extract_strided_slice %46 {offsets = [0, 0, 0], sizes = [2, 2, 32], strides = [1, 1, 1]} : vector<2x2x128xf32> to vector<2x2x32xf32>
    %48 = arith.negf %47 : vector<2x2x32xf32>
    %49 = math.exp %48 : vector<2x2x32xf32>
    %cst_23 = arith.constant 1.000000e+00 : f32
    %50 = vector.broadcast %cst_23 : f32 to vector<2x2x32xf32>
    %51 = arith.addf %50, %49 : vector<2x2x32xf32>
    %52 = arith.divf %50, %51 : vector<2x2x32xf32>
    %53 = vector.extract_strided_slice %46 {offsets = [0, 0, 32], sizes = [2, 2, 32], strides = [1, 1, 1]} : vector<2x2x128xf32> to vector<2x2x32xf32>
    %54 = arith.negf %53 : vector<2x2x32xf32>
    %55 = math.exp %54 : vector<2x2x32xf32>
    %cst_24 = arith.constant 1.000000e+00 : f32
    %56 = vector.broadcast %cst_24 : f32 to vector<2x2x32xf32>
    %57 = arith.addf %56, %55 : vector<2x2x32xf32>
    %58 = arith.divf %56, %57 : vector<2x2x32xf32>
    %59 = vector.extract_strided_slice %46 {offsets = [0, 0, 64], sizes = [2, 2, 32], strides = [1, 1, 1]} : vector<2x2x128xf32> to vector<2x2x32xf32>
    %60 = math.tanh %59 : vector<2x2x32xf32>
    %61 = vector.extract_strided_slice %46 {offsets = [0, 0, 96], sizes = [2, 2, 32], strides = [1, 1, 1]} : vector<2x2x128xf32> to vector<2x2x32xf32>
    %62 = arith.negf %61 : vector<2x2x32xf32>
    %63 = math.exp %62 : vector<2x2x32xf32>
    %cst_25 = arith.constant 1.000000e+00 : f32
    %64 = vector.broadcast %cst_25 : f32 to vector<2x2x32xf32>
    %65 = arith.addf %64, %63 : vector<2x2x32xf32>
    %66 = arith.divf %64, %65 : vector<2x2x32xf32>
    %67 = arith.mulf %58, %34 : vector<2x2x32xf32>
    %68 = arith.mulf %52, %60 : vector<2x2x32xf32>
    %69 = arith.addf %67, %68 : vector<2x2x32xf32>
    %70 = math.tanh %69 : vector<2x2x32xf32>
    %71 = arith.mulf %66, %70 : vector<2x2x32xf32>
    %72 = arith.index_cast %c1_i32 : i32 to index
    %c0_26 = arith.constant 0 : index
    %c0_27 = arith.constant 0 : index
    %c0_28 = arith.constant 0 : index
    %73 = vector.load %arg3[%72, %c0_26, %c0_27, %c0_28] : memref<8x2x2x32xf32, #tpu.memory_space<vmem>>, vector<1x2x2x32xf32>
    %74 = vector.shape_cast %73 : vector<1x2x2x32xf32> to vector<2x2x32xf32>
    %75 = vector.shape_cast %71 : vector<2x2x32xf32> to vector<1x2x2x32xf32>
    tpu.vector_store %arg3[%72, %c0_26, %c0_27, %c0_28], %75 {strides = array<i32>} : memref<8x2x2x32xf32, #tpu.memory_space<vmem>>, vector<1x2x2x32xf32>,
    %c2_i32 = arith.constant 2 : i32
    %76 = arith.truncf %71 : vector<2x2x32xf32> to vector<2x2x32xbf16>
    "tpu.trace_start"() <{level = 10 : i32, message = "dbh,dhg->dbg"}> : () -> ()
    %cst_29 = arith.constant dense<0.000000e+00> : vector<2x2x128xf32>
    %77 = tpu.matmul %76, %3, %cst_29 {dimension_numbers = #tpu.dot_dimension_numbers<[2], [1], [1], [2], [0, 0, 0, 1, 1, 2], [0], [0]>} : vector<2x2x32xbf16>, vector<2x32x128xbf16>, vector<2x2x128xf32> -> vector<2x2x128xf32>
    "tpu.trace_stop"() : () -> ()
    %78 = arith.index_cast %c2_i32 : i32 to index
    %c0_30 = arith.constant 0 : index
    %c0_31 = arith.constant 0 : index
    %c0_32 = arith.constant 0 : index
    %79 = vector.load %arg1[%78, %c0_30, %c0_31, %c0_32] : memref<8x2x2x128xf32, #tpu.memory_space<vmem>>, vector<1x2x2x128xf32>
    %80 = vector.shape_cast %79 : vector<1x2x2x128xf32> to vector<2x2x128xf32>
    %81 = arith.addf %80, %77 : vector<2x2x128xf32>
    %82 = vector.extract_strided_slice %81 {offsets = [0, 0, 0], sizes = [2, 2, 32], strides = [1, 1, 1]} : vector<2x2x128xf32> to vector<2x2x32xf32>
    %83 = arith.negf %82 : vector<2x2x32xf32>
    %84 = math.exp %83 : vector<2x2x32xf32>
    %cst_33 = arith.constant 1.000000e+00 : f32
    %85 = vector.broadcast %cst_33 : f32 to vector<2x2x32xf32>
    %86 = arith.addf %85, %84 : vector<2x2x32xf32>
    %87 = arith.divf %85, %86 : vector<2x2x32xf32>
    %88 = vector.extract_strided_slice %81 {offsets = [0, 0, 32], sizes = [2, 2, 32], strides = [1, 1, 1]} : vector<2x2x128xf32> to vector<2x2x32xf32>
    %89 = arith.negf %88 : vector<2x2x32xf32>
    %90 = math.exp %89 : vector<2x2x32xf32>
    %cst_34 = arith.constant 1.000000e+00 : f32
    %91 = vector.broadcast %cst_34 : f32 to vector<2x2x32xf32>
    %92 = arith.addf %91, %90 : vector<2x2x32xf32>
    %93 = arith.divf %91, %92 : vector<2x2x32xf32>
    %94 = vector.extract_strided_slice %81 {offsets = [0, 0, 64], sizes = [2, 2, 32], strides = [1, 1, 1]} : vector<2x2x128xf32> to vector<2x2x32xf32>
    %95 = math.tanh %94 : vector<2x2x32xf32>
    %96 = vector.extract_strided_slice %81 {offsets = [0, 0, 96], sizes = [2, 2, 32], strides = [1, 1, 1]} : vector<2x2x128xf32> to vector<2x2x32xf32>
    %97 = arith.negf %96 : vector<2x2x32xf32>
    %98 = math.exp %97 : vector<2x2x32xf32>
    %cst_35 = arith.constant 1.000000e+00 : f32
    %99 = vector.broadcast %cst_35 : f32 to vector<2x2x32xf32>
    %100 = arith.addf %99, %98 : vector<2x2x32xf32>
    %101 = arith.divf %99, %100 : vector<2x2x32xf32>
    %102 = arith.mulf %93, %69 : vector<2x2x32xf32>
    %103 = arith.mulf %87, %95 : vector<2x2x32xf32>
    %104 = arith.addf %102, %103 : vector<2x2x32xf32>
    %105 = math.tanh %104 : vector<2x2x32xf32>
    %106 = arith.mulf %101, %105 : vector<2x2x32xf32>
    %107 = arith.index_cast %c2_i32 : i32 to index
    %c0_36 = arith.constant 0 : index
    %c0_37 = arith.constant 0 : index
    %c0_38 = arith.constant 0 : index
    %108 = vector.load %arg3[%107, %c0_36, %c0_37, %c0_38] : memref<8x2x2x32xf32, #tpu.memory_space<vmem>>, vector<1x2x2x32xf32>
    %109 = vector.shape_cast %108 : vector<1x2x2x32xf32> to vector<2x2x32xf32>
    %110 = vector.shape_cast %106 : vector<2x2x32xf32> to vector<1x2x2x32xf32>
    tpu.vector_store %arg3[%107, %c0_36, %c0_37, %c0_38], %110 {strides = array<i32>} : memref<8x2x2x32xf32, #tpu.memory_space<vmem>>, vector<1x2x2x32xf32>,
    %c3_i32 = arith.constant 3 : i32
    %111 = arith.truncf %106 : vector<2x2x32xf32> to vector<2x2x32xbf16>
    "tpu.trace_start"() <{level = 10 : i32, message = "dbh,dhg->dbg"}> : () -> ()
    %cst_39 = arith.constant dense<0.000000e+00> : vector<2x2x128xf32>
    %112 = tpu.matmul %111, %3, %cst_39 {dimension_numbers = #tpu.dot_dimension_numbers<[2], [1], [1], [2], [0, 0, 0, 1, 1, 2], [0], [0]>} : vector<2x2x32xbf16>, vector<2x32x128xbf16>, vector<2x2x128xf32> -> vector<2x2x128xf32>
    "tpu.trace_stop"() : () -> ()
    %113 = arith.index_cast %c3_i32 : i32 to index
    %c0_40 = arith.constant 0 : index
    %c0_41 = arith.constant 0 : index
    %c0_42 = arith.constant 0 : index
    %114 = vector.load %arg1[%113, %c0_40, %c0_41, %c0_42] : memref<8x2x2x128xf32, #tpu.memory_space<vmem>>, vector<1x2x2x128xf32>
    %115 = vector.shape_cast %114 : vector<1x2x2x128xf32> to vector<2x2x128xf32>
    %116 = arith.addf %115, %112 : vector<2x2x128xf32>
    %117 = vector.extract_strided_slice %116 {offsets = [0, 0, 0], sizes = [2, 2, 32], strides = [1, 1, 1]} : vector<2x2x128xf32> to vector<2x2x32xf32>
    %118 = arith.negf %117 : vector<2x2x32xf32>
    %119 = math.exp %118 : vector<2x2x32xf32>
    %cst_43 = arith.constant 1.000000e+00 : f32
    %120 = vector.broadcast %cst_43 : f32 to vector<2x2x32xf32>
    %121 = arith.addf %120, %119 : vector<2x2x32xf32>
    %122 = arith.divf %120, %121 : vector<2x2x32xf32>
    %123 = vector.extract_strided_slice %116 {offsets = [0, 0, 32], sizes = [2, 2, 32], strides = [1, 1, 1]} : vector<2x2x128xf32> to vector<2x2x32xf32>
    %124 = arith.negf %123 : vector<2x2x32xf32>
    %125 = math.exp %124 : vector<2x2x32xf32>
    %cst_44 = arith.constant 1.000000e+00 : f32
    %126 = vector.broadcast %cst_44 : f32 to vector<2x2x32xf32>
    %127 = arith.addf %126, %125 : vector<2x2x32xf32>
    %128 = arith.divf %126, %127 : vector<2x2x32xf32>
    %129 = vector.extract_strided_slice %116 {offsets = [0, 0, 64], sizes = [2, 2, 32], strides = [1, 1, 1]} : vector<2x2x128xf32> to vector<2x2x32xf32>
    %130 = math.tanh %129 : vector<2x2x32xf32>
    %131 = vector.extract_strided_slice %116 {offsets = [0, 0, 96], sizes = [2, 2, 32], strides = [1, 1, 1]} : vector<2x2x128xf32> to vector<2x2x32xf32>
    %132 = arith.negf %131 : vector<2x2x32xf32>
    %133 = math.exp %132 : vector<2x2x32xf32>
    %cst_45 = arith.constant 1.000000e+00 : f32
    %134 = vector.broadcast %cst_45 : f32 to vector<2x2x32xf32>
    %135 = arith.addf %134, %133 : vector<2x2x32xf32>
    %136 = arith.divf %134, %135 : vector<2x2x32xf32>
    %137 = arith.mulf %128, %104 : vector<2x2x32xf32>
    %138 = arith.mulf %122, %130 : vector<2x2x32xf32>
    %139 = arith.addf %137, %138 : vector<2x2x32xf32>
    %140 = math.tanh %139 : vector<2x2x32xf32>
    %141 = arith.mulf %136, %140 : vector<2x2x32xf32>
    %142 = arith.index_cast %c3_i32 : i32 to index
    %c0_46 = arith.constant 0 : index
    %c0_47 = arith.constant 0 : index
    %c0_48 = arith.constant 0 : index
    %143 = vector.load %arg3[%142, %c0_46, %c0_47, %c0_48] : memref<8x2x2x32xf32, #tpu.memory_space<vmem>>, vector<1x2x2x32xf32>
    %144 = vector.shape_cast %143 : vector<1x2x2x32xf32> to vector<2x2x32xf32>
    %145 = vector.shape_cast %141 : vector<2x2x32xf32> to vector<1x2x2x32xf32>
    tpu.vector_store %arg3[%142, %c0_46, %c0_47, %c0_48], %145 {strides = array<i32>} : memref<8x2x2x32xf32, #tpu.memory_space<vmem>>, vector<1x2x2x32xf32>,
    %c4_i32 = arith.constant 4 : i32
    %146 = arith.truncf %141 : vector<2x2x32xf32> to vector<2x2x32xbf16>
    "tpu.trace_start"() <{level = 10 : i32, message = "dbh,dhg->dbg"}> : () -> ()
    %cst_49 = arith.constant dense<0.000000e+00> : vector<2x2x128xf32>
    %147 = tpu.matmul %146, %3, %cst_49 {dimension_numbers = #tpu.dot_dimension_numbers<[2], [1], [1], [2], [0, 0, 0, 1, 1, 2], [0], [0]>} : vector<2x2x32xbf16>, vector<2x32x128xbf16>, vector<2x2x128xf32> -> vector<2x2x128xf32>
    "tpu.trace_stop"() : () -> ()
    %148 = arith.index_cast %c4_i32 : i32 to index
    %c0_50 = arith.constant 0 : index
    %c0_51 = arith.constant 0 : index
    %c0_52 = arith.constant 0 : index
    %149 = vector.load %arg1[%148, %c0_50, %c0_51, %c0_52] : memref<8x2x2x128xf32, #tpu.memory_space<vmem>>, vector<1x2x2x128xf32>
    %150 = vector.shape_cast %149 : vector<1x2x2x128xf32> to vector<2x2x128xf32>
    %151 = arith.addf %150, %147 : vector<2x2x128xf32>
    %152 = vector.extract_strided_slice %151 {offsets = [0, 0, 0], sizes = [2, 2, 32], strides = [1, 1, 1]} : vector<2x2x128xf32> to vector<2x2x32xf32>
    %153 = arith.negf %152 : vector<2x2x32xf32>
    %154 = math.exp %153 : vector<2x2x32xf32>
    %cst_53 = arith.constant 1.000000e+00 : f32
    %155 = vector.broadcast %cst_53 : f32 to vector<2x2x32xf32>
    %156 = arith.addf %155, %154 : vector<2x2x32xf32>
    %157 = arith.divf %155, %156 : vector<2x2x32xf32>
    %158 = vector.extract_strided_slice %151 {offsets = [0, 0, 32], sizes = [2, 2, 32], strides = [1, 1, 1]} : vector<2x2x128xf32> to vector<2x2x32xf32>
    %159 = arith.negf %158 : vector<2x2x32xf32>
    %160 = math.exp %159 : vector<2x2x32xf32>
    %cst_54 = arith.constant 1.000000e+00 : f32
    %161 = vector.broadcast %cst_54 : f32 to vector<2x2x32xf32>
    %162 = arith.addf %161, %160 : vector<2x2x32xf32>
    %163 = arith.divf %161, %162 : vector<2x2x32xf32>
    %164 = vector.extract_strided_slice %151 {offsets = [0, 0, 64], sizes = [2, 2, 32], strides = [1, 1, 1]} : vector<2x2x128xf32> to vector<2x2x32xf32>
    %165 = math.tanh %164 : vector<2x2x32xf32>
    %166 = vector.extract_strided_slice %151 {offsets = [0, 0, 96], sizes = [2, 2, 32], strides = [1, 1, 1]} : vector<2x2x128xf32> to vector<2x2x32xf32>
    %167 = arith.negf %166 : vector<2x2x32xf32>
    %168 = math.exp %167 : vector<2x2x32xf32>
    %cst_55 = arith.constant 1.000000e+00 : f32
    %169 = vector.broadcast %cst_55 : f32 to vector<2x2x32xf32>
    %170 = arith.addf %169, %168 : vector<2x2x32xf32>
    %171 = arith.divf %169, %170 : vector<2x2x32xf32>
    %172 = arith.mulf %163, %139 : vector<2x2x32xf32>
    %173 = arith.mulf %157, %165 : vector<2x2x32xf32>
    %174 = arith.addf %172, %173 : vector<2x2x32xf32>
    %175 = math.tanh %174 : vector<2x2x32xf32>
    %176 = arith.mulf %171, %175 : vector<2x2x32xf32>
    %177 = arith.index_cast %c4_i32 : i32 to index
    %c0_56 = arith.constant 0 : index
    %c0_57 = arith.constant 0 : index
    %c0_58 = arith.constant 0 : index
    %178 = vector.load %arg3[%177, %c0_56, %c0_57, %c0_58] : memref<8x2x2x32xf32, #tpu.memory_space<vmem>>, vector<1x2x2x32xf32>
    %179 = vector.shape_cast %178 : vector<1x2x2x32xf32> to vector<2x2x32xf32>
    %180 = vector.shape_cast %176 : vector<2x2x32xf32> to vector<1x2x2x32xf32>
    tpu.vector_store %arg3[%177, %c0_56, %c0_57, %c0_58], %180 {strides = array<i32>} : memref<8x2x2x32xf32, #tpu.memory_space<vmem>>, vector<1x2x2x32xf32>,
    %c5_i32 = arith.constant 5 : i32
    %181 = arith.truncf %176 : vector<2x2x32xf32> to vector<2x2x32xbf16>
    "tpu.trace_start"() <{level = 10 : i32, message = "dbh,dhg->dbg"}> : () -> ()
    %cst_59 = arith.constant dense<0.000000e+00> : vector<2x2x128xf32>
    %182 = tpu.matmul %181, %3, %cst_59 {dimension_numbers = #tpu.dot_dimension_numbers<[2], [1], [1], [2], [0, 0, 0, 1, 1, 2], [0], [0]>} : vector<2x2x32xbf16>, vector<2x32x128xbf16>, vector<2x2x128xf32> -> vector<2x2x128xf32>
    "tpu.trace_stop"() : () -> ()
    %183 = arith.index_cast %c5_i32 : i32 to index
    %c0_60 = arith.constant 0 : index
    %c0_61 = arith.constant 0 : index
    %c0_62 = arith.constant 0 : index
    %184 = vector.load %arg1[%183, %c0_60, %c0_61, %c0_62] : memref<8x2x2x128xf32, #tpu.memory_space<vmem>>, vector<1x2x2x128xf32>
    %185 = vector.shape_cast %184 : vector<1x2x2x128xf32> to vector<2x2x128xf32>
    %186 = arith.addf %185, %182 : vector<2x2x128xf32>
    %187 = vector.extract_strided_slice %186 {offsets = [0, 0, 0], sizes = [2, 2, 32], strides = [1, 1, 1]} : vector<2x2x128xf32> to vector<2x2x32xf32>
    %188 = arith.negf %187 : vector<2x2x32xf32>
    %189 = math.exp %188 : vector<2x2x32xf32>
    %cst_63 = arith.constant 1.000000e+00 : f32
    %190 = vector.broadcast %cst_63 : f32 to vector<2x2x32xf32>
    %191 = arith.addf %190, %189 : vector<2x2x32xf32>
    %192 = arith.divf %190, %191 : vector<2x2x32xf32>
    %193 = vector.extract_strided_slice %186 {offsets = [0, 0, 32], sizes = [2, 2, 32], strides = [1, 1, 1]} : vector<2x2x128xf32> to vector<2x2x32xf32>
    %194 = arith.negf %193 : vector<2x2x32xf32>
    %195 = math.exp %194 : vector<2x2x32xf32>
    %cst_64 = arith.constant 1.000000e+00 : f32
    %196 = vector.broadcast %cst_64 : f32 to vector<2x2x32xf32>
    %197 = arith.addf %196, %195 : vector<2x2x32xf32>
    %198 = arith.divf %196, %197 : vector<2x2x32xf32>
    %199 = vector.extract_strided_slice %186 {offsets = [0, 0, 64], sizes = [2, 2, 32], strides = [1, 1, 1]} : vector<2x2x128xf32> to vector<2x2x32xf32>
    %200 = math.tanh %199 : vector<2x2x32xf32>
    %201 = vector.extract_strided_slice %186 {offsets = [0, 0, 96], sizes = [2, 2, 32], strides = [1, 1, 1]} : vector<2x2x128xf32> to vector<2x2x32xf32>
    %202 = arith.negf %201 : vector<2x2x32xf32>
    %203 = math.exp %202 : vector<2x2x32xf32>
    %cst_65 = arith.constant 1.000000e+00 : f32
    %204 = vector.broadcast %cst_65 : f32 to vector<2x2x32xf32>
    %205 = arith.addf %204, %203 : vector<2x2x32xf32>
    %206 = arith.divf %204, %205 : vector<2x2x32xf32>
    %207 = arith.mulf %198, %174 : vector<2x2x32xf32>
    %208 = arith.mulf %192, %200 : vector<2x2x32xf32>
    %209 = arith.addf %207, %208 : vector<2x2x32xf32>
    %210 = math.tanh %209 : vector<2x2x32xf32>
    %211 = arith.mulf %206, %210 : vector<2x2x32xf32>
    %212 = arith.index_cast %c5_i32 : i32 to index
    %c0_66 = arith.constant 0 : index
    %c0_67 = arith.constant 0 : index
    %c0_68 = arith.constant 0 : index
    %213 = vector.load %arg3[%212, %c0_66, %c0_67, %c0_68] : memref<8x2x2x32xf32, #tpu.memory_space<vmem>>, vector<1x2x2x32xf32>
    %214 = vector.shape_cast %213 : vector<1x2x2x32xf32> to vector<2x2x32xf32>
    %215 = vector.shape_cast %211 : vector<2x2x32xf32> to vector<1x2x2x32xf32>
    tpu.vector_store %arg3[%212, %c0_66, %c0_67, %c0_68], %215 {strides = array<i32>} : memref<8x2x2x32xf32, #tpu.memory_space<vmem>>, vector<1x2x2x32xf32>,
    %c6_i32 = arith.constant 6 : i32
    %216 = arith.truncf %211 : vector<2x2x32xf32> to vector<2x2x32xbf16>
    "tpu.trace_start"() <{level = 10 : i32, message = "dbh,dhg->dbg"}> : () -> ()
    %cst_69 = arith.constant dense<0.000000e+00> : vector<2x2x128xf32>
    %217 = tpu.matmul %216, %3, %cst_69 {dimension_numbers = #tpu.dot_dimension_numbers<[2], [1], [1], [2], [0, 0, 0, 1, 1, 2], [0], [0]>} : vector<2x2x32xbf16>, vector<2x32x128xbf16>, vector<2x2x128xf32> -> vector<2x2x128xf32>
    "tpu.trace_stop"() : () -> ()
    %218 = arith.index_cast %c6_i32 : i32 to index
    %c0_70 = arith.constant 0 : index
    %c0_71 = arith.constant 0 : index
    %c0_72 = arith.constant 0 : index
    %219 = vector.load %arg1[%218, %c0_70, %c0_71, %c0_72] : memref<8x2x2x128xf32, #tpu.memory_space<vmem>>, vector<1x2x2x128xf32>
    %220 = vector.shape_cast %219 : vector<1x2x2x128xf32> to vector<2x2x128xf32>
    %221 = arith.addf %220, %217 : vector<2x2x128xf32>
    %222 = vector.extract_strided_slice %221 {offsets = [0, 0, 0], sizes = [2, 2, 32], strides = [1, 1, 1]} : vector<2x2x128xf32> to vector<2x2x32xf32>
    %223 = arith.negf %222 : vector<2x2x32xf32>
    %224 = math.exp %223 : vector<2x2x32xf32>
    %cst_73 = arith.constant 1.000000e+00 : f32
    %225 = vector.broadcast %cst_73 : f32 to vector<2x2x32xf32>
    %226 = arith.addf %225, %224 : vector<2x2x32xf32>
    %227 = arith.divf %225, %226 : vector<2x2x32xf32>
    %228 = vector.extract_strided_slice %221 {offsets = [0, 0, 32], sizes = [2, 2, 32], strides = [1, 1, 1]} : vector<2x2x128xf32> to vector<2x2x32xf32>
    %229 = arith.negf %228 : vector<2x2x32xf32>
    %230 = math.exp %229 : vector<2x2x32xf32>
    %cst_74 = arith.constant 1.000000e+00 : f32
    %231 = vector.broadcast %cst_74 : f32 to vector<2x2x32xf32>
    %232 = arith.addf %231, %230 : vector<2x2x32xf32>
    %233 = arith.divf %231, %232 : vector<2x2x32xf32>
    %234 = vector.extract_strided_slice %221 {offsets = [0, 0, 64], sizes = [2, 2, 32], strides = [1, 1, 1]} : vector<2x2x128xf32> to vector<2x2x32xf32>
    %235 = math.tanh %234 : vector<2x2x32xf32>
    %236 = vector.extract_strided_slice %221 {offsets = [0, 0, 96], sizes = [2, 2, 32], strides = [1, 1, 1]} : vector<2x2x128xf32> to vector<2x2x32xf32>
    %237 = arith.negf %236 : vector<2x2x32xf32>
    %238 = math.exp %237 : vector<2x2x32xf32>
    %cst_75 = arith.constant 1.000000e+00 : f32
    %239 = vector.broadcast %cst_75 : f32 to vector<2x2x32xf32>
    %240 = arith.addf %239, %238 : vector<2x2x32xf32>
    %241 = arith.divf %239, %240 : vector<2x2x32xf32>
    %242 = arith.mulf %233, %209 : vector<2x2x32xf32>
    %243 = arith.mulf %227, %235 : vector<2x2x32xf32>
    %244 = arith.addf %242, %243 : vector<2x2x32xf32>
    %245 = math.tanh %244 : vector<2x2x32xf32>
    %246 = arith.mulf %241, %245 : vector<2x2x32xf32>
    %247 = arith.index_cast %c6_i32 : i32 to index
    %c0_76 = arith.constant 0 : index
    %c0_77 = arith.constant 0 : index
    %c0_78 = arith.constant 0 : index
    %248 = vector.load %arg3[%247, %c0_76, %c0_77, %c0_78] : memref<8x2x2x32xf32, #tpu.memory_space<vmem>>, vector<1x2x2x32xf32>
    %249 = vector.shape_cast %248 : vector<1x2x2x32xf32> to vector<2x2x32xf32>
    %250 = vector.shape_cast %246 : vector<2x2x32xf32> to vector<1x2x2x32xf32>
    tpu.vector_store %arg3[%247, %c0_76, %c0_77, %c0_78], %250 {strides = array<i32>} : memref<8x2x2x32xf32, #tpu.memory_space<vmem>>, vector<1x2x2x32xf32>,
    %c7_i32 = arith.constant 7 : i32
    %251 = arith.truncf %246 : vector<2x2x32xf32> to vector<2x2x32xbf16>
    "tpu.trace_start"() <{level = 10 : i32, message = "dbh,dhg->dbg"}> : () -> ()
    %cst_79 = arith.constant dense<0.000000e+00> : vector<2x2x128xf32>
    %252 = tpu.matmul %251, %3, %cst_79 {dimension_numbers = #tpu.dot_dimension_numbers<[2], [1], [1], [2], [0, 0, 0, 1, 1, 2], [0], [0]>} : vector<2x2x32xbf16>, vector<2x32x128xbf16>, vector<2x2x128xf32> -> vector<2x2x128xf32>
    "tpu.trace_stop"() : () -> ()
    %253 = arith.index_cast %c7_i32 : i32 to index
    %c0_80 = arith.constant 0 : index
    %c0_81 = arith.constant 0 : index
    %c0_82 = arith.constant 0 : index
    %254 = vector.load %arg1[%253, %c0_80, %c0_81, %c0_82] : memref<8x2x2x128xf32, #tpu.memory_space<vmem>>, vector<1x2x2x128xf32>
    %255 = vector.shape_cast %254 : vector<1x2x2x128xf32> to vector<2x2x128xf32>
    %256 = arith.addf %255, %252 : vector<2x2x128xf32>
    %257 = vector.extract_strided_slice %256 {offsets = [0, 0, 0], sizes = [2, 2, 32], strides = [1, 1, 1]} : vector<2x2x128xf32> to vector<2x2x32xf32>
    %258 = arith.negf %257 : vector<2x2x32xf32>
    %259 = math.exp %258 : vector<2x2x32xf32>
    %cst_83 = arith.constant 1.000000e+00 : f32
    %260 = vector.broadcast %cst_83 : f32 to vector<2x2x32xf32>
    %261 = arith.addf %260, %259 : vector<2x2x32xf32>
    %262 = arith.divf %260, %261 : vector<2x2x32xf32>
    %263 = vector.extract_strided_slice %256 {offsets = [0, 0, 32], sizes = [2, 2, 32], strides = [1, 1, 1]} : vector<2x2x128xf32> to vector<2x2x32xf32>
    %264 = arith.negf %263 : vector<2x2x32xf32>
    %265 = math.exp %264 : vector<2x2x32xf32>
    %cst_84 = arith.constant 1.000000e+00 : f32
    %266 = vector.broadcast %cst_84 : f32 to vector<2x2x32xf32>
    %267 = arith.addf %266, %265 : vector<2x2x32xf32>
    %268 = arith.divf %266, %267 : vector<2x2x32xf32>
    %269 = vector.extract_strided_slice %256 {offsets = [0, 0, 64], sizes = [2, 2, 32], strides = [1, 1, 1]} : vector<2x2x128xf32> to vector<2x2x32xf32>
    %270 = math.tanh %269 : vector<2x2x32xf32>
    %271 = vector.extract_strided_slice %256 {offsets = [0, 0, 96], sizes = [2, 2, 32], strides = [1, 1, 1]} : vector<2x2x128xf32> to vector<2x2x32xf32>
    %272 = arith.negf %271 : vector<2x2x32xf32>
    %273 = math.exp %272 : vector<2x2x32xf32>
    %cst_85 = arith.constant 1.000000e+00 : f32
    %274 = vector.broadcast %cst_85 : f32 to vector<2x2x32xf32>
    %275 = arith.addf %274, %273 : vector<2x2x32xf32>
    %276 = arith.divf %274, %275 : vector<2x2x32xf32>
    %277 = arith.mulf %268, %244 : vector<2x2x32xf32>
    %278 = arith.mulf %262, %270 : vector<2x2x32xf32>
    %279 = arith.addf %277, %278 : vector<2x2x32xf32>
    %280 = math.tanh %279 : vector<2x2x32xf32>
    %281 = arith.mulf %276, %280 : vector<2x2x32xf32>
    %282 = arith.index_cast %c7_i32 : i32 to index
    %c0_86 = arith.constant 0 : index
    %c0_87 = arith.constant 0 : index
    %c0_88 = arith.constant 0 : index
    %283 = vector.load %arg3[%282, %c0_86, %c0_87, %c0_88] : memref<8x2x2x32xf32, #tpu.memory_space<vmem>>, vector<1x2x2x32xf32>
    %284 = vector.shape_cast %283 : vector<1x2x2x32xf32> to vector<2x2x32xf32>
    %285 = vector.shape_cast %281 : vector<2x2x32xf32> to vector<1x2x2x32xf32>
    tpu.vector_store %arg3[%282, %c0_86, %c0_87, %c0_88], %285 {strides = array<i32>} : memref<8x2x2x32xf32, #tpu.memory_space<vmem>>, vector<1x2x2x32xf32>,
    %c8_i32 = arith.constant 8 : i32
    %c0_89 = arith.constant 0 : index
    %c0_90 = arith.constant 0 : index
    %c0_91 = arith.constant 0 : index
    %286 = vector.load %arg6[%c0_89, %c0_90, %c0_91] : memref<2x2x32xf32, #tpu.memory_space<vmem>>, vector<2x2x32xf32>
    tpu.vector_store %arg6[%c0_89, %c0_90, %c0_91], %281 {strides = array<i32>} : memref<2x2x32xf32, #tpu.memory_space<vmem>>, vector<2x2x32xf32>,
    %c0_92 = arith.constant 0 : index
    %c0_93 = arith.constant 0 : index
    %c0_94 = arith.constant 0 : index
    %287 = vector.load %arg7[%c0_92, %c0_93, %c0_94] : memref<2x2x32xf32, #tpu.memory_space<vmem>>, vector<2x2x32xf32>
    tpu.vector_store %arg7[%c0_92, %c0_93, %c0_94], %279 {strides = array<i32>} : memref<2x2x32xf32, #tpu.memory_space<vmem>>, vector<2x2x32xf32>,
    %c0_i32_95 = arith.constant 0 : i32
    %288 = arith.cmpi eq, %arg0, %c0_i32_95 : i32
    %289 = arith.extui %288 : i1 to i32
    %c0_i32_96 = arith.constant 0 : i32
    %290 = arith.cmpi ne, %289, %c0_i32_96 : i32
    scf.if %290 {
      %c0_97 = arith.constant 0 : index
      %c0_98 = arith.constant 0 : index
      %c0_99 = arith.constant 0 : index
      %291 = vector.load %arg6[%c0_97, %c0_98, %c0_99] : memref<2x2x32xf32, #tpu.memory_space<vmem>>, vector<2x2x32xf32>
      %c0_100 = arith.constant 0 : index
      %c0_101 = arith.constant 0 : index
      %c0_102 = arith.constant 0 : index
      %292 = vector.load %arg4[%c0_100, %c0_101, %c0_102] : memref<2x2x32xf32, #tpu.memory_space<vmem>>, vector<2x2x32xf32>
      tpu.vector_store %arg4[%c0_100, %c0_101, %c0_102], %291 {strides = array<i32>} : memref<2x2x32xf32, #tpu.memory_space<vmem>>, vector<2x2x32xf32>,
      %c0_103 = arith.constant 0 : index
      %c0_104 = arith.constant 0 : index
      %c0_105 = arith.constant 0 : index
      %293 = vector.load %arg7[%c0_103, %c0_104, %c0_105] : memref<2x2x32xf32, #tpu.memory_space<vmem>>, vector<2x2x32xf32>
      %c0_106 = arith.constant 0 : index
      %c0_107 = arith.constant 0 : index
      %c0_108 = arith.constant 0 : index
      %294 = vector.load %arg5[%c0_106, %c0_107, %c0_108] : memref<2x2x32xf32, #tpu.memory_space<vmem>>, vector<2x2x32xf32>
      tpu.vector_store %arg5[%c0_106, %c0_107, %c0_108], %293 {strides = array<i32>} : memref<2x2x32xf32, #tpu.memory_space<vmem>>, vector<2x2x32xf32>,
    } else {
    }
    return
  }
  func.func @transform_0(%arg0: i32) -> (i32, i32, i32, i32) {
    %c0_i32 = arith.constant 0 : i32
    %c0_i32_0 = arith.constant 0 : i32
    %c0_i32_1 = arith.constant 0 : i32
    %c0_i32_2 = arith.constant 0 : i32
    return %arg0, %c0_i32, %c0_i32_0, %c0_i32_1 : i32, i32, i32, i32
  }
  func.func @transform_1(%arg0: i32) -> (i32, i32, i32) {
    %c0_i32 = arith.constant 0 : i32
    %c0_i32_0 = arith.constant 0 : i32
    %c0_i32_1 = arith.constant 0 : i32
    %c0_i32_2 = arith.constant 0 : i32
    return %c0_i32, %c0_i32_0, %c0_i32_1 : i32, i32, i32
  }
  func.func @transform_2(%arg0: i32) -> (i32, i32, i32, i32) {
    %c0_i32 = arith.constant 0 : i32
    %c0_i32_0 = arith.constant 0 : i32
    %c0_i32_1 = arith.constant 0 : i32
    %c0_i32_2 = arith.constant 0 : i32
    return %arg0, %c0_i32, %c0_i32_0, %c0_i32_1 : i32, i32, i32, i32
  }
  func.func @transform_3(%arg0: i32) -> (i32, i32, i32) {
    %c0_i32 = arith.constant 0 : i32
    %c0_i32_0 = arith.constant 0 : i32
    %c0_i32_1 = arith.constant 0 : i32
    %c0_i32_2 = arith.constant 0 : i32
    return %c0_i32, %c0_i32_0, %c0_i32_1 : i32, i32, i32
  }
  func.func @transform_4(%arg0: i32) -> (i32, i32, i32) {
    %c0_i32 = arith.constant 0 : i32
    %c0_i32_0 = arith.constant 0 : i32
    %c0_i32_1 = arith.constant 0 : i32
    %c0_i32_2 = arith.constant 0 : i32
    return %c0_i32, %c0_i32_0, %c0_i32_1 : i32, i32, i32
  }
}

</mosaic_0001>

<bundles_post_ra>
// kernel: encoder_forward.2
= control target key start
LH: loop header
LB: loop body
LE: loop exit
PB: predicated region body
PF: predicated region fallthrough
CT: control target
= control target key end

     0   :  { %vm19_vm0 = vcmask 254976   ;;  %v1738_v0 = vmov 0.0   ;;  %vm1739_vm1 = vmmov 0   ;;  %vm50_vm2 = vcmask 261120   ;;  %s1740_s23 = smov 32   ;;  %s1741_s27 = smov 64   ;;  %s2238_s1 = inlined_call_operand.vmem [shape: bf16[2,32,128], index: 1, kind: input, shape index: {}]   ;;  %s2239_s0 = inlined_call_operand.vmem [shape: f32[8,2,2,128], index: 0, kind: input, shape index: {}]   ;;  %s2240_s2 = inlined_call_operand.vmem [shape: f32[8,2,2,32], index: 2, kind: output, shape index: {0}]   ;;  %s2241_s4 = inlined_call_operand.vmem [shape: f32[2,2,32], index: 4, kind: output, shape index: {2}]   ;;  %s2242_s3 = inlined_call_operand.vmem [shape: f32[2,2,32], index: 3, kind: output, shape index: {1}]  }
   0x1   :  { %1473 = vmatprep.subr.bf16.mxu0 %v1738_v0  ;;  %v1772_v1 = vld [vmem:[%s2238_s1] sm:$0xff]   ;;  %1481 = vmatprep.subr.bf16.mxu1 %v1738_v0  ;;  %20 = vst.msk [vmem:[#allocation2] sm:$0x3] %vm19_vm0, %v1738_v0  ;;  %21 = vst.msk [vmem:[#allocation2 + $0x2] sm:$0x3] %vm19_vm0, %v1738_v0  ;;  %v1786_v2 = vld [vmem:[%s2238_s1 + $0x10] sm:$0xff]  }
   0x2   :  { %22 = vst.msk [vmem:[#allocation3] sm:$0x3] %vm19_vm0, %v1738_v0  ;;  %23 = vst.msk [vmem:[#allocation3 + $0x2] sm:$0x3] %vm19_vm0, %v1738_v0  ;;  %1477 = vmatprep.mubr.msk.bf16.mxu0 %vm1739_vm1, %v1738_v0  ;;  %1485 = vmatprep.mubr.msk.bf16.mxu1 %vm1739_vm1, %v1738_v0  ;;  %v1796_v3 = vld [vmem:[%s2238_s1 + $0x8] sm:$0xff]   ;;  %v1803_v4 = vld [vmem:[%s2238_s1 + $0x18] sm:$0xff]  }
   0x3   :  { %1474 = vmatpush3.bf16.msra.mxu0 %v1772_v1  ;;  %1482 = vmatpush3.bf16.msra.mxu1 %v1786_v2  ;;  %v149_v11 = vld [vmem:[%s2239_s0] sm:$0x3]  ;;  %v150_v12 = vld [vmem:[%s2239_s0 + $0x2] sm:$0x3]  ;;  %v1371_v55 = vld [vmem:[%s2239_s0 + $0x4] sm:$0x3] }
   0x4   :  { %1475 = vmatprep.subr.bf16.mxu0 %v1738_v0  ;;  %1483 = vmatprep.subr.bf16.mxu1 %v1738_v0  ;;  %v1372_v60 = vld [vmem:[%s2239_s0 + $0x6] sm:$0x3] }
   0x7   :  { %1476 = vmatpush3.bf16.msra.mxu0 %v1796_v3  ;;  %1484 = vmatpush3.bf16.msra.mxu1 %v1803_v4 }
   0x8   :  { %v32_v5 = vld [vmem:[#allocation2] sm:$0x3]  ;;  %v33_v6 = vld [vmem:[#allocation2 + $0x2] sm:$0x3]  ;;  %1489 = vmatprep.subr.bf16.mxu0 %v1738_v0  ;;  %1497 = vmatprep.subr.bf16.mxu1 %v1738_v0 }
   0x9   :  { %v34_v7 = vld [vmem:[#allocation3] sm:$0x3]  ;;  %v36_v8 = vpack.c.bf16 %v32_v5, %v32_v5  ;;  %v37_v9 = vpack.c.bf16 %v33_v6, %v33_v6  ;;  %v35_v10 = vld [vmem:[#allocation3 + $0x2] sm:$0x3] }
   0xa   :  { %169 = vrot.lane.b32.xlu1 %v34_v7, %s1740_s23 }
   0xb   :  { %1478 = vmatmul.mubr.msk.bf16.vlgmr.msra.gmra.mrb[0].mxu0 %vm50_vm2, %v36_v8  ;;  %1486 = vmatmul.mubr.msk.bf16.vlgmr.msra.gmra.mrb[0].mxu1 %vm50_vm2, %v37_v9 }
   0xc   :  { %1490 = vmatpush3.bf16.msra.mxu0 %v1772_v1  ;;  %1498 = vmatpush3.bf16.msra.mxu1 %v1786_v2 }
   0xd   :  { %1491 = vmatprep.subr.bf16.mxu0 %v1738_v0  ;;  %1493 = vmatprep.mubr.msk.bf16.mxu0 %vm1739_vm1, %v1738_v0 }
   0xe   :  { %171 = vrot.lane.b32.xlu1 %v35_v10, %s1740_s23  ;;  %1499 = vmatprep.subr.bf16.mxu1 %v1738_v0 }
   0xf   :  { %1501 = vmatprep.mubr.msk.bf16.mxu1 %vm1739_vm1, %v1738_v0 }
  0x10   :  { %1492 = vmatpush3.bf16.msra.mxu0 %v1796_v3  ;;  %1500 = vmatpush3.bf16.msra.mxu1 %v1803_v4 }
  0x11   :  { %1505 = vmatprep.subr.bf16.mxu0 %v1738_v0  ;;  %1513 = vmatprep.subr.bf16.mxu1 %v1738_v0 }
  0x7c   :  { %v170_v37 = vpop.permute.xlu1 %169 }
  0x80   :  { %v172_v39 = vpop.permute.xlu1 %171 }
  0xde   :  { %v88_v13 = vpop.f32.mrb[0].mxu0  ;;  %v143_v14 = vpop.f32.mrb[0].mxu1 }
  0xdf   :  { %v151_v15 = vadd.f32 %v149_v11, %v88_v13  ;;  %v1479_v16 = vpop.f32.mrb[1].mxu0  ;;  %v152_v17 = vadd.f32 %v150_v12, %v143_v14  ;;  %v1487_v18 = vpop.f32.mrb[1].mxu1 }
  0xe0   :  { %v91_v19 = vpop.f32.mrb[2].mxu0  ;;  %v146_v20 = vpop.f32.mrb[2].mxu1 }
  0xe1   :  { %1610 = vtanh.f32 %v151_v15  ;;  %v1480_v21 = vpop.f32.mrb[3].mxu0  ;;  %v1488_v22 = vpop.f32.mrb[3].mxu1  ;;  %v1367_v25 = vmul.f32 -1.442695, %v151_v15  ;;  %v1368_v26 = vmul.f32 -1.442695, %v152_v17 }
  0xe2   :  { %1612 = vtanh.f32 %v152_v17 }
  0xe3   :  { %1614 = vpow2.f32 %v1367_v25 }
  0xe4   :  { %1616 = vpow2.f32 %v1368_v26 }
  0xeb   :  { %v1611_v23 = vpop.eup %1610 }
  0xec   :  { %179 = vrot.lane.b32.xlu0 %v1611_v23, %s1741_s27  ;;  %v1613_v24 = vpop.eup %1612 }
  0xed   :  { %v1615_v27 = vpop.eup %1614 }
  0xee   :  { %v159_v28 = vadd.f32 1.0, %v1615_v27  ;;  %v1617_v29 = vpop.eup %1616 }
  0xef   :  { %v160_v30 = vadd.f32 1.0, %v1617_v29 }
  0xf0   :  { %181 = vrot.lane.b32.xlu0 %v1613_v24, %s1741_s27  ;;  %1618 = vrcp.f32 %v159_v28 }
  0xf1   :  { %1620 = vrcp.f32 %v160_v30 }
  0xfa   :  { %v1619_v31 = vpop.eup %1618 }
  0xfb   :  { %v1621_v34 = vpop.eup %1620  ;;  %v175_v38 = vmul.f32 %v1619_v31, %v170_v37 }
  0xfc   :  { %v176_v42 = vmul.f32 %v1621_v34, %v172_v39 }
 0x15e   :  { %v180_v32 = vpop.permute.xlu0 %179 }
 0x15f   :  { %v185_v33 = vmul.f32 %v1619_v31, %v180_v32 }
 0x161   :  { %189 = vrot.lane.b32.xlu0 %v185_v33, %s1740_s23 }
 0x162   :  { %v182_v35 = vpop.permute.xlu0 %181 }
 0x163   :  { %v186_v36 = vmul.f32 %v1621_v34, %v182_v35 }
 0x165   :  { %191 = vrot.lane.b32.xlu1 %v186_v36, %s1740_s23 }
 0x1d3   :  { %v190_v40 = vpop.permute.xlu0 %189 }
 0x1d4   :  { %v1836_v41 = vadd.f32 %v190_v40, %v175_v38  ;;  %v1379_v38 = vld [vmem:[%s2239_s0 + $0x8] sm:$0x3] }
 0x1d6   :  { %1622 = vtanh.f32 %v1836_v41 }
 0x1d7   :  { %v192_v43 = vpop.permute.xlu1 %191 }
 0x1d8   :  { %v1839_v44 = vadd.f32 %v192_v43, %v176_v42  ;;  %v1380_v43 = vld [vmem:[%s2239_s0 + $0xa] sm:$0x3] }
 0x1da   :  { %1624 = vtanh.f32 %v1839_v44 }
 0x1e0   :  { %v1623_v45 = vpop.eup %1622 }
 0x1e1   :  { %201 = vrot.lane.b32.xlu0 %v1623_v45, %s1741_s27 }
 0x1e4   :  { %v1625_v46 = vpop.eup %1624 }
 0x1e5   :  { %203 = vrot.lane.b32.xlu1 %v1625_v46, %s1741_s27 }
 0x253   :  { %v202_v47 = vpop.permute.xlu0 %201 }
 0x254   :  { %v1844_v48 = vmul.f32 %v1619_v31, %v202_v47 }
 0x256   :  { %v220_v49 = vpack.c.bf16 %v1844_v48, %v1844_v48 }
 0x257   :  { %v204_v50 = vpop.permute.xlu1 %203 }
 0x258   :  { %v1848_v51 = vmul.f32 %v1621_v34, %v204_v50  ;;  %223 = vrot.lane.b32.xlu0 %v220_v49, %s1740_s23 }
 0x25a   :  { %v221_v52 = vpack.c.bf16 %v1848_v51, %v1848_v51 }
 0x25c   :  { %269 = vrot.lane.b32.xlu1 %v221_v52, %s1740_s23 }
 0x2ca   :  { %v224_v53 = vpop.permute.xlu0 %223 }
 0x2cb   :  { %1494 = vmatmul.mubr.msk.bf16.vlgmr.msra.gmra.mrb[4].mxu0 %vm50_vm2, %v224_v53 }
 0x2cc   :  { %1506 = vmatpush3.bf16.msra.mxu0 %v1772_v1  ;;  %1509 = vmatprep.mubr.msk.bf16.mxu0 %vm1739_vm1, %v1738_v0 }
 0x2cd   :  { %1507 = vmatprep.subr.bf16.mxu0 %v1738_v0 }
 0x2ce   :  { %v270_v54 = vpop.permute.xlu1 %269 }
 0x2cf   :  { %1502 = vmatmul.mubr.msk.bf16.vlgmr.msra.gmra.mrb[4].mxu1 %vm50_vm2, %v270_v54 }
 0x2d0   :  { %1514 = vmatpush3.bf16.msra.mxu1 %v1786_v2  ;;  %1508 = vmatpush3.bf16.msra.mxu0 %v1796_v3 }
 0x2d1   :  { %1515 = vmatprep.subr.bf16.mxu1 %v1738_v0  ;;  %1517 = vmatprep.mubr.msk.bf16.mxu1 %vm1739_vm1, %v1738_v0 }
 0x2d2   :  { %1521 = vmatprep.subr.bf16.mxu0 %v1738_v0 }
 0x2d4   :  { %1516 = vmatpush3.bf16.msra.mxu1 %v1803_v4 }
 0x2d5   :  { %1529 = vmatprep.subr.bf16.mxu1 %v1738_v0 }
 0x39e   :  { %v262_v56 = vpop.f32.mrb[4].mxu0 }
 0x39f   :  { %v317_v57 = vadd.f32 %v1371_v55, %v262_v56  ;;  %v1495_v58 = vpop.f32.mrb[5].mxu0 }
 0x3a0   :  { %v265_v59 = vpop.f32.mrb[6].mxu0 }
 0x3a1   :  { %1626 = vtanh.f32 %v317_v57  ;;  %v1496_v61 = vpop.f32.mrb[7].mxu0  ;;  %v1373_v10 = vmul.f32 -1.442695, %v317_v57 }
 0x3a2   :  { %v308_v62 = vpop.f32.mrb[4].mxu1 }
 0x3a3   :  { %v318_v63 = vadd.f32 %v1372_v60, %v308_v62  ;;  %v1503_v5 = vpop.f32.mrb[5].mxu1 }
 0x3a4   :  { %v311_v6 = vpop.f32.mrb[6].mxu1 }
 0x3a5   :  { %1628 = vtanh.f32 %v318_v63  ;;  %v1504_v7 = vpop.f32.mrb[7].mxu1  ;;  %v1374_v11 = vmul.f32 -1.442695, %v318_v63 }
 0x3a6   :  { %1630 = vpow2.f32 %v1373_v10 }
 0x3a7   :  { %1632 = vpow2.f32 %v1374_v11 }
 0x3ab   :  { %v1627_v8 = vpop.eup %1626 }
 0x3ac   :  { %337 = vrot.lane.b32.xlu0 %v1627_v8, %s1741_s27 }
 0x3af   :  { %v1629_v9 = vpop.eup %1628 }
 0x3b0   :  { %339 = vrot.lane.b32.xlu1 %v1629_v9, %s1741_s27  ;;  %v1631_v12 = vpop.eup %1630 }
 0x3b1   :  { %v325_v13 = vadd.f32 1.0, %v1631_v12  ;;  %v1633_v14 = vpop.eup %1632 }
 0x3b2   :  { %v326_v15 = vadd.f32 1.0, %v1633_v14 }
 0x3b3   :  { %1634 = vrcp.f32 %v325_v13 }
 0x3b4   :  { %1636 = vrcp.f32 %v326_v15 }
 0x3bd   :  { %v1635_v16 = vpop.eup %1634 }
 0x3be   :  { %v1637_v19 = vpop.eup %1636  ;;  %v333_v22 = vmul.f32 %v1635_v16, %v1836_v41 }
 0x3bf   :  { %v334_v25 = vmul.f32 %v1637_v19, %v1839_v44 }
 0x41e   :  { %v338_v17 = vpop.permute.xlu0 %337 }
 0x41f   :  { %v343_v18 = vmul.f32 %v1635_v16, %v338_v17 }
 0x421   :  { %347 = vrot.lane.b32.xlu0 %v343_v18, %s1740_s23 }
 0x422   :  { %v340_v20 = vpop.permute.xlu1 %339 }
 0x423   :  { %v344_v21 = vmul.f32 %v1637_v19, %v340_v20 }
 0x425   :  { %349 = vrot.lane.b32.xlu1 %v344_v21, %s1740_s23 }
 0x493   :  { %v348_v23 = vpop.permute.xlu0 %347 }
 0x494   :  { %v1879_v24 = vadd.f32 %v348_v23, %v333_v22  ;;  %v1387_v23 = vld [vmem:[%s2239_s0 + $0xc] sm:$0x3] }
 0x496   :  { %1638 = vtanh.f32 %v1879_v24 }
 0x497   :  { %v350_v26 = vpop.permute.xlu1 %349 }
 0x498   :  { %v1883_v27 = vadd.f32 %v350_v26, %v334_v25 }
 0x49a   :  { %1640 = vtanh.f32 %v1883_v27 }
 0x4a0   :  { %v1639_v28 = vpop.eup %1638 }
 0x4a1   :  { %359 = vrot.lane.b32.xlu0 %v1639_v28, %s1741_s27  ;;  %v1388_v28 = vld [vmem:[%s2239_s0 + $0xe] sm:$0x3] }
 0x4a4   :  { %v1641_v29 = vpop.eup %1640 }
 0x4a5   :  { %361 = vrot.lane.b32.xlu1 %v1641_v29, %s1741_s27 }
 0x513   :  { %v360_v30 = vpop.permute.xlu0 %359 }
 0x514   :  { %v1888_v31 = vmul.f32 %v1635_v16, %v360_v30 }
 0x516   :  { %v378_v32 = vpack.c.bf16 %v1888_v31, %v1888_v31 }
 0x517   :  { %v362_v33 = vpop.permute.xlu1 %361 }
 0x518   :  { %v1892_v34 = vmul.f32 %v1637_v19, %v362_v33  ;;  %381 = vrot.lane.b32.xlu0 %v378_v32, %s1740_s23 }
 0x51a   :  { %v379_v35 = vpack.c.bf16 %v1892_v34, %v1892_v34 }
 0x51c   :  { %427 = vrot.lane.b32.xlu1 %v379_v35, %s1740_s23 }
 0x58a   :  { %v382_v36 = vpop.permute.xlu0 %381 }
 0x58b   :  { %1510 = vmatmul.mubr.msk.bf16.vlgmr.msra.gmra.mrb[8].mxu0 %vm50_vm2, %v382_v36 }
 0x58c   :  { %1522 = vmatpush3.bf16.msra.mxu0 %v1772_v1  ;;  %1525 = vmatprep.mubr.msk.bf16.mxu0 %vm1739_vm1, %v1738_v0 }
 0x58d   :  { %1523 = vmatprep.subr.bf16.mxu0 %v1738_v0 }
 0x58e   :  { %v428_v37 = vpop.permute.xlu1 %427 }
 0x58f   :  { %1518 = vmatmul.mubr.msk.bf16.vlgmr.msra.gmra.mrb[8].mxu1 %vm50_vm2, %v428_v37 }
 0x590   :  { %1530 = vmatpush3.bf16.msra.mxu1 %v1786_v2  ;;  %1524 = vmatpush3.bf16.msra.mxu0 %v1796_v3 }
 0x591   :  { %1531 = vmatprep.subr.bf16.mxu1 %v1738_v0  ;;  %1533 = vmatprep.mubr.msk.bf16.mxu1 %vm1739_vm1, %v1738_v0 }
 0x592   :  { %1537 = vmatprep.subr.bf16.mxu0 %v1738_v0 }
 0x594   :  { %1532 = vmatpush3.bf16.msra.mxu1 %v1803_v4 }
 0x595   :  { %1545 = vmatprep.subr.bf16.mxu1 %v1738_v0 }
 0x65e   :  { %v420_v39 = vpop.f32.mrb[8].mxu0 }
 0x65f   :  { %v475_v40 = vadd.f32 %v1379_v38, %v420_v39  ;;  %v1511_v41 = vpop.f32.mrb[9].mxu0 }
 0x660   :  { %v423_v42 = vpop.f32.mrb[10].mxu0 }
 0x661   :  { %1642 = vtanh.f32 %v475_v40  ;;  %v1512_v44 = vpop.f32.mrb[11].mxu0  ;;  %v1381_v54 = vmul.f32 -1.442695, %v475_v40 }
 0x662   :  { %v466_v45 = vpop.f32.mrb[8].mxu1 }
 0x663   :  { %v476_v46 = vadd.f32 %v1380_v43, %v466_v45  ;;  %v1519_v47 = vpop.f32.mrb[9].mxu1 }
 0x664   :  { %v469_v49 = vpop.f32.mrb[10].mxu1 }
 0x665   :  { %1644 = vtanh.f32 %v476_v46  ;;  %v1520_v50 = vpop.f32.mrb[11].mxu1  ;;  %v1382_v55 = vmul.f32 -1.442695, %v476_v46 }
 0x666   :  { %1646 = vpow2.f32 %v1381_v54 }
 0x667   :  { %1648 = vpow2.f32 %v1382_v55 }
 0x66b   :  { %v1643_v52 = vpop.eup %1642 }
 0x66c   :  { %495 = vrot.lane.b32.xlu0 %v1643_v52, %s1741_s27 }
 0x66f   :  { %v1645_v53 = vpop.eup %1644 }
 0x670   :  { %497 = vrot.lane.b32.xlu1 %v1645_v53, %s1741_s27  ;;  %v1647_v56 = vpop.eup %1646 }
 0x671   :  { %v483_v57 = vadd.f32 1.0, %v1647_v56  ;;  %v1649_v58 = vpop.eup %1648 }
 0x672   :  { %v484_v59 = vadd.f32 1.0, %v1649_v58 }
 0x673   :  { %1650 = vrcp.f32 %v483_v57 }
 0x674   :  { %1652 = vrcp.f32 %v484_v59 }
 0x67d   :  { %v1651_v60 = vpop.eup %1650 }
 0x67e   :  { %v1653_v63 = vpop.eup %1652  ;;  %v491_v7 = vmul.f32 %v1651_v60, %v1879_v24 }
 0x67f   :  { %v492_v10 = vmul.f32 %v1653_v63, %v1883_v27 }
 0x6de   :  { %v496_v61 = vpop.permute.xlu0 %495 }
 0x6df   :  { %v501_v62 = vmul.f32 %v1651_v60, %v496_v61 }
 0x6e1   :  { %505 = vrot.lane.b32.xlu0 %v501_v62, %s1740_s23 }
 0x6e2   :  { %v498_v5 = vpop.permute.xlu1 %497 }
 0x6e3   :  { %v502_v6 = vmul.f32 %v1653_v63, %v498_v5 }
 0x6e5   :  { %507 = vrot.lane.b32.xlu1 %v502_v6, %s1740_s23 }
 0x753   :  { %v506_v8 = vpop.permute.xlu0 %505 }
 0x754   :  { %v1923_v9 = vadd.f32 %v506_v8, %v491_v7 }
 0x756   :  { %1654 = vtanh.f32 %v1923_v9 }
 0x757   :  { %v508_v11 = vpop.permute.xlu1 %507 }
 0x758   :  { %v1927_v12 = vadd.f32 %v508_v11, %v492_v10  ;;  %v1395_v10 = vld [vmem:[%s2239_s0 + $0x10] sm:$0x3] }
 0x75a   :  { %1656 = vtanh.f32 %v1927_v12 }
 0x760   :  { %v1655_v13 = vpop.eup %1654 }
 0x761   :  { %517 = vrot.lane.b32.xlu0 %v1655_v13, %s1741_s27 }
 0x764   :  { %v1657_v14 = vpop.eup %1656 }
 0x765   :  { %519 = vrot.lane.b32.xlu1 %v1657_v14, %s1741_s27 }
 0x7d3   :  { %v518_v15 = vpop.permute.xlu0 %517 }
 0x7d4   :  { %v1932_v16 = vmul.f32 %v1651_v60, %v518_v15  ;;  %v1396_v15 = vld [vmem:[%s2239_s0 + $0x12] sm:$0x3] }
 0x7d6   :  { %v536_v17 = vpack.c.bf16 %v1932_v16, %v1932_v16 }
 0x7d7   :  { %v520_v18 = vpop.permute.xlu1 %519 }
 0x7d8   :  { %v1936_v19 = vmul.f32 %v1653_v63, %v520_v18  ;;  %539 = vrot.lane.b32.xlu0 %v536_v17, %s1740_s23 }
 0x7da   :  { %v537_v20 = vpack.c.bf16 %v1936_v19, %v1936_v19 }
 0x7dc   :  { %585 = vrot.lane.b32.xlu1 %v537_v20, %s1740_s23 }
 0x84a   :  { %v540_v21 = vpop.permute.xlu0 %539 }
 0x84b   :  { %1526 = vmatmul.mubr.msk.bf16.vlgmr.msra.gmra.mrb[12].mxu0 %vm50_vm2, %v540_v21 }
 0x84c   :  { %1538 = vmatpush3.bf16.msra.mxu0 %v1772_v1  ;;  %1541 = vmatprep.mubr.msk.bf16.mxu0 %vm1739_vm1, %v1738_v0 }
 0x84d   :  { %1539 = vmatprep.subr.bf16.mxu0 %v1738_v0 }
 0x84e   :  { %v586_v22 = vpop.permute.xlu1 %585 }
 0x84f   :  { %1534 = vmatmul.mubr.msk.bf16.vlgmr.msra.gmra.mrb[12].mxu1 %vm50_vm2, %v586_v22 }
 0x850   :  { %1546 = vmatpush3.bf16.msra.mxu1 %v1786_v2  ;;  %1540 = vmatpush3.bf16.msra.mxu0 %v1796_v3 }
 0x851   :  { %1547 = vmatprep.subr.bf16.mxu1 %v1738_v0  ;;  %1549 = vmatprep.mubr.msk.bf16.mxu1 %vm1739_vm1, %v1738_v0 }
 0x852   :  { %1553 = vmatprep.subr.bf16.mxu0 %v1738_v0 }
 0x854   :  { %1548 = vmatpush3.bf16.msra.mxu1 %v1803_v4 }
 0x855   :  { %1561 = vmatprep.subr.bf16.mxu1 %v1738_v0 }
 0x91e   :  { %v578_v24 = vpop.f32.mrb[12].mxu0 }
 0x91f   :  { %v633_v25 = vadd.f32 %v1387_v23, %v578_v24  ;;  %v1527_v26 = vpop.f32.mrb[13].mxu0 }
 0x920   :  { %v581_v27 = vpop.f32.mrb[14].mxu0 }
 0x921   :  { %1658 = vtanh.f32 %v633_v25  ;;  %v1528_v29 = vpop.f32.mrb[15].mxu0  ;;  %v1389_v39 = vmul.f32 -1.442695, %v633_v25 }
 0x922   :  { %v624_v30 = vpop.f32.mrb[12].mxu1 }
 0x923   :  { %v634_v32 = vadd.f32 %v1388_v28, %v624_v30  ;;  %v1535_v33 = vpop.f32.mrb[13].mxu1 }
 0x924   :  { %v627_v35 = vpop.f32.mrb[14].mxu1 }
 0x925   :  { %1660 = vtanh.f32 %v634_v32  ;;  %v1536_v36 = vpop.f32.mrb[15].mxu1  ;;  %v1390_v40 = vmul.f32 -1.442695, %v634_v32 }
 0x926   :  { %1662 = vpow2.f32 %v1389_v39 }
 0x927   :  { %1664 = vpow2.f32 %v1390_v40 }
 0x92b   :  { %v1659_v37 = vpop.eup %1658 }
 0x92c   :  { %653 = vrot.lane.b32.xlu0 %v1659_v37, %s1741_s27 }
 0x92f   :  { %v1661_v38 = vpop.eup %1660 }
 0x930   :  { %655 = vrot.lane.b32.xlu1 %v1661_v38, %s1741_s27  ;;  %v1663_v41 = vpop.eup %1662 }
 0x931   :  { %v641_v42 = vadd.f32 1.0, %v1663_v41  ;;  %v1665_v43 = vpop.eup %1664 }
 0x932   :  { %v642_v44 = vadd.f32 1.0, %v1665_v43 }
 0x933   :  { %1666 = vrcp.f32 %v641_v42 }
 0x934   :  { %1668 = vrcp.f32 %v642_v44 }
 0x93d   :  { %v1667_v45 = vpop.eup %1666 }
 0x93e   :  { %v1669_v49 = vpop.eup %1668  ;;  %v649_v53 = vmul.f32 %v1667_v45, %v1923_v9 }
 0x93f   :  { %v650_v56 = vmul.f32 %v1669_v49, %v1927_v12 }
 0x99e   :  { %v654_v46 = vpop.permute.xlu0 %653 }
 0x99f   :  { %v659_v47 = vmul.f32 %v1667_v45, %v654_v46 }
 0x9a1   :  { %663 = vrot.lane.b32.xlu0 %v659_v47, %s1740_s23 }
 0x9a2   :  { %v656_v50 = vpop.permute.xlu1 %655 }
 0x9a3   :  { %v660_v52 = vmul.f32 %v1669_v49, %v656_v50 }
 0x9a5   :  { %665 = vrot.lane.b32.xlu1 %v660_v52, %s1740_s23 }
 0xa13   :  { %v664_v54 = vpop.permute.xlu0 %663 }
 0xa14   :  { %v1967_v55 = vadd.f32 %v664_v54, %v649_v53 }
 0xa16   :  { %1670 = vtanh.f32 %v1967_v55 }
 0xa17   :  { %v666_v57 = vpop.permute.xlu1 %665 }
 0xa18   :  { %v1971_v58 = vadd.f32 %v666_v57, %v650_v56 }
 0xa1a   :  { %1672 = vtanh.f32 %v1971_v58 }
 0xa20   :  { %v1671_v59 = vpop.eup %1670 }
 0xa21   :  { %675 = vrot.lane.b32.xlu0 %v1671_v59, %s1741_s27 }
 0xa24   :  { %v1673_v60 = vpop.eup %1672 }
 0xa25   :  { %677 = vrot.lane.b32.xlu1 %v1673_v60, %s1741_s27 }
 0xa93   :  { %v676_v61 = vpop.permute.xlu0 %675 }
 0xa94   :  { %v1976_v62 = vmul.f32 %v1667_v45, %v676_v61 }
 0xa96   :  { %v694_v63 = vpack.c.bf16 %v1976_v62, %v1976_v62 }
 0xa97   :  { %v678_v5 = vpop.permute.xlu1 %677 }
 0xa98   :  { %v1980_v6 = vmul.f32 %v1669_v49, %v678_v5  ;;  %697 = vrot.lane.b32.xlu0 %v694_v63, %s1740_s23  ;;  %v1404_v5 = vld [vmem:[%s2239_s0 + $0x16] sm:$0x3] }
 0xa9a   :  { %v695_v7 = vpack.c.bf16 %v1980_v6, %v1980_v6 }
 0xa9c   :  { %743 = vrot.lane.b32.xlu1 %v695_v7, %s1740_s23 }
 0xb0a   :  { %v698_v8 = vpop.permute.xlu0 %697 }
 0xb0b   :  { %1542 = vmatmul.mubr.msk.bf16.vlgmr.msra.gmra.mrb[16].mxu0 %vm50_vm2, %v698_v8 }
 0xb0c   :  { %1554 = vmatpush3.bf16.msra.mxu0 %v1772_v1  ;;  %1557 = vmatprep.mubr.msk.bf16.mxu0 %vm1739_vm1, %v1738_v0 }
 0xb0d   :  { %1555 = vmatprep.subr.bf16.mxu0 %v1738_v0 }
 0xb0e   :  { %v744_v9 = vpop.permute.xlu1 %743 }
 0xb0f   :  { %1550 = vmatmul.mubr.msk.bf16.vlgmr.msra.gmra.mrb[16].mxu1 %vm50_vm2, %v744_v9 }
 0xb10   :  { %1562 = vmatpush3.bf16.msra.mxu1 %v1786_v2  ;;  %1556 = vmatpush3.bf16.msra.mxu0 %v1796_v3 }
 0xb11   :  { %1563 = vmatprep.subr.bf16.mxu1 %v1738_v0  ;;  %1565 = vmatprep.mubr.msk.bf16.mxu1 %vm1739_vm1, %v1738_v0 }
 0xb12   :  { %1569 = vmatprep.subr.bf16.mxu0 %v1738_v0 }
 0xb14   :  { %1564 = vmatpush3.bf16.msra.mxu1 %v1803_v4 }
 0xb15   :  { %1577 = vmatprep.subr.bf16.mxu1 %v1738_v0 }
 0xbde   :  { %v736_v11 = vpop.f32.mrb[16].mxu0 }
 0xbdf   :  { %v791_v12 = vadd.f32 %v1395_v10, %v736_v11  ;;  %v1543_v13 = vpop.f32.mrb[17].mxu0 }
 0xbe0   :  { %v739_v14 = vpop.f32.mrb[18].mxu0 }
 0xbe1   :  { %1674 = vtanh.f32 %v791_v12  ;;  %v1544_v17 = vpop.f32.mrb[19].mxu0  ;;  %v1397_v26 = vmul.f32 -1.442695, %v791_v12 }
 0xbe2   :  { %v782_v18 = vpop.f32.mrb[16].mxu1 }
 0xbe3   :  { %v792_v20 = vadd.f32 %v1396_v15, %v782_v18  ;;  %v1551_v21 = vpop.f32.mrb[17].mxu1 }
 0xbe4   :  { %v785_v22 = vpop.f32.mrb[18].mxu1 }
 0xbe5   :  { %1676 = vtanh.f32 %v792_v20  ;;  %v1552_v23 = vpop.f32.mrb[19].mxu1  ;;  %v1398_v27 = vmul.f32 -1.442695, %v792_v20 }
 0xbe6   :  { %1678 = vpow2.f32 %v1397_v26 }
 0xbe7   :  { %1680 = vpow2.f32 %v1398_v27 }
 0xbeb   :  { %v1675_v24 = vpop.eup %1674 }
 0xbec   :  { %811 = vrot.lane.b32.xlu0 %v1675_v24, %s1741_s27 }
 0xbef   :  { %v1677_v25 = vpop.eup %1676 }
 0xbf0   :  { %813 = vrot.lane.b32.xlu1 %v1677_v25, %s1741_s27  ;;  %v1679_v28 = vpop.eup %1678 }
 0xbf1   :  { %v799_v29 = vadd.f32 1.0, %v1679_v28  ;;  %v1681_v30 = vpop.eup %1680 }
 0xbf2   :  { %v800_v32 = vadd.f32 1.0, %v1681_v30 }
 0xbf3   :  { %1682 = vrcp.f32 %v799_v29 }
 0xbf4   :  { %1684 = vrcp.f32 %v800_v32 }
 0xbfd   :  { %v1683_v33 = vpop.eup %1682 }
 0xbfe   :  { %v1685_v37 = vpop.eup %1684  ;;  %v807_v40 = vmul.f32 %v1683_v33, %v1967_v55 }
 0xbff   :  { %v808_v43 = vmul.f32 %v1685_v37, %v1971_v58  ;;  %v1403_v58 = vld [vmem:[%s2239_s0 + $0x14] sm:$0x3] }
 0xc5e   :  { %v812_v35 = vpop.permute.xlu0 %811 }
 0xc5f   :  { %v817_v36 = vmul.f32 %v1683_v33, %v812_v35 }
 0xc61   :  { %821 = vrot.lane.b32.xlu0 %v817_v36, %s1740_s23 }
 0xc62   :  { %v814_v38 = vpop.permute.xlu1 %813 }
 0xc63   :  { %v818_v39 = vmul.f32 %v1685_v37, %v814_v38 }
 0xc65   :  { %823 = vrot.lane.b32.xlu1 %v818_v39, %s1740_s23 }
 0xcd3   :  { %v822_v41 = vpop.permute.xlu0 %821 }
 0xcd4   :  { %v2011_v42 = vadd.f32 %v822_v41, %v807_v40 }
 0xcd6   :  { %1686 = vtanh.f32 %v2011_v42 }
 0xcd7   :  { %v824_v44 = vpop.permute.xlu1 %823 }
 0xcd8   :  { %v2015_v45 = vadd.f32 %v824_v44, %v808_v43 }
 0xcda   :  { %1688 = vtanh.f32 %v2015_v45 }
 0xce0   :  { %v1687_v46 = vpop.eup %1686 }
 0xce1   :  { %833 = vrot.lane.b32.xlu0 %v1687_v46, %s1741_s27 }
 0xce4   :  { %v1689_v47 = vpop.eup %1688 }
 0xce5   :  { %835 = vrot.lane.b32.xlu1 %v1689_v47, %s1741_s27 }
 0xd53   :  { %v834_v49 = vpop.permute.xlu0 %833 }
 0xd54   :  { %v2020_v50 = vmul.f32 %v1683_v33, %v834_v49 }
 0xd56   :  { %v852_v52 = vpack.c.bf16 %v2020_v50, %v2020_v50 }
 0xd57   :  { %v836_v53 = vpop.permute.xlu1 %835 }
 0xd58   :  { %v2024_v54 = vmul.f32 %v1685_v37, %v836_v53  ;;  %855 = vrot.lane.b32.xlu0 %v852_v52, %s1740_s23 }
 0xd5a   :  { %v853_v55 = vpack.c.bf16 %v2024_v54, %v2024_v54 }
 0xd5c   :  { %901 = vrot.lane.b32.xlu1 %v853_v55, %s1740_s23 }
 0xdca   :  { %v856_v56 = vpop.permute.xlu0 %855 }
 0xdcb   :  { %1558 = vmatmul.mubr.msk.bf16.vlgmr.msra.gmra.mrb[20].mxu0 %vm50_vm2, %v856_v56 }
 0xdcc   :  { %1570 = vmatpush3.bf16.msra.mxu0 %v1772_v1  ;;  %1573 = vmatprep.mubr.msk.bf16.mxu0 %vm1739_vm1, %v1738_v0 }
 0xdcd   :  { %1571 = vmatprep.subr.bf16.mxu0 %v1738_v0 }
 0xdce   :  { %v902_v57 = vpop.permute.xlu1 %901 }
 0xdcf   :  { %1566 = vmatmul.mubr.msk.bf16.vlgmr.msra.gmra.mrb[20].mxu1 %vm50_vm2, %v902_v57 }
 0xdd0   :  { %1578 = vmatpush3.bf16.msra.mxu1 %v1786_v2  ;;  %1572 = vmatpush3.bf16.msra.mxu0 %v1796_v3 }
 0xdd1   :  { %1579 = vmatprep.subr.bf16.mxu1 %v1738_v0  ;;  %1581 = vmatprep.mubr.msk.bf16.mxu1 %vm1739_vm1, %v1738_v0 }
 0xdd2   :  { %1585 = vmatprep.subr.bf16.mxu0 %v1738_v0 }
 0xdd4   :  { %1580 = vmatpush3.bf16.msra.mxu1 %v1803_v4 }
 0xdd5   :  { %1593 = vmatprep.subr.bf16.mxu1 %v1738_v0 }
 0xe9e   :  { %v894_v59 = vpop.f32.mrb[20].mxu0 }
 0xe9f   :  { %v949_v60 = vadd.f32 %v1403_v58, %v894_v59  ;;  %v1559_v61 = vpop.f32.mrb[21].mxu0 }
 0xea0   :  { %v897_v63 = vpop.f32.mrb[22].mxu0 }
 0xea1   :  { %1690 = vtanh.f32 %v949_v60  ;;  %v1560_v7 = vpop.f32.mrb[23].mxu0  ;;  %v1405_v15 = vmul.f32 -1.442695, %v949_v60 }
 0xea2   :  { %v940_v8 = vpop.f32.mrb[20].mxu1 }
 0xea3   :  { %v950_v9 = vadd.f32 %v1404_v5, %v940_v8  ;;  %v1567_v10 = vpop.f32.mrb[21].mxu1 }
 0xea4   :  { %v943_v11 = vpop.f32.mrb[22].mxu1 }
 0xea5   :  { %1692 = vtanh.f32 %v950_v9  ;;  %v1568_v12 = vpop.f32.mrb[23].mxu1  ;;  %v1406_v17 = vmul.f32 -1.442695, %v950_v9 }
 0xea6   :  { %1694 = vpow2.f32 %v1405_v15 }
 0xea7   :  { %1696 = vpow2.f32 %v1406_v17 }
 0xeab   :  { %v1691_v13 = vpop.eup %1690 }
 0xeac   :  { %969 = vrot.lane.b32.xlu0 %v1691_v13, %s1741_s27 }
 0xeaf   :  { %v1693_v14 = vpop.eup %1692 }
 0xeb0   :  { %971 = vrot.lane.b32.xlu1 %v1693_v14, %s1741_s27  ;;  %v1695_v18 = vpop.eup %1694 }
 0xeb1   :  { %v957_v20 = vadd.f32 1.0, %v1695_v18  ;;  %v1697_v21 = vpop.eup %1696 }
 0xeb2   :  { %v958_v22 = vadd.f32 1.0, %v1697_v21 }
 0xeb3   :  { %1698 = vrcp.f32 %v957_v20 }
 0xeb4   :  { %1700 = vrcp.f32 %v958_v22 }
 0xebd   :  { %v1699_v23 = vpop.eup %1698 }
 0xebe   :  { %v1701_v26 = vpop.eup %1700  ;;  %v965_v29 = vmul.f32 %v1699_v23, %v2011_v42 }
 0xebf   :  { %v966_v33 = vmul.f32 %v1701_v26, %v2015_v45 }
 0xf1e   :  { %v970_v24 = vpop.permute.xlu0 %969 }
 0xf1f   :  { %v975_v25 = vmul.f32 %v1699_v23, %v970_v24 }
 0xf21   :  { %979 = vrot.lane.b32.xlu0 %v975_v25, %s1740_s23 }
 0xf22   :  { %v972_v27 = vpop.permute.xlu1 %971 }
 0xf23   :  { %v976_v28 = vmul.f32 %v1701_v26, %v972_v27 }
 0xf25   :  { %981 = vrot.lane.b32.xlu1 %v976_v28, %s1740_s23 }
 0xf93   :  { %v980_v30 = vpop.permute.xlu0 %979 }
 0xf94   :  { %v2055_v32 = vadd.f32 %v980_v30, %v965_v29 }
 0xf96   :  { %1702 = vtanh.f32 %v2055_v32 }
 0xf97   :  { %v982_v35 = vpop.permute.xlu1 %981 }
 0xf98   :  { %v2059_v36 = vadd.f32 %v982_v35, %v966_v33  ;;  %v1419_v35 = vld [vmem:[%s2239_s0 + $0x1c] sm:$0x3] }
 0xf9a   :  { %1704 = vtanh.f32 %v2059_v36 }
 0xfa0   :  { %v1703_v37 = vpop.eup %1702 }
 0xfa1   :  { %991 = vrot.lane.b32.xlu0 %v1703_v37, %s1741_s27 }
 0xfa4   :  { %v1705_v38 = vpop.eup %1704 }
 0xfa5   :  { %993 = vrot.lane.b32.xlu1 %v1705_v38, %s1741_s27 }
0x1013   :  { %v992_v39 = vpop.permute.xlu0 %991 }
0x1014   :  { %v2064_v40 = vmul.f32 %v1699_v23, %v992_v39 }
0x1016   :  { %v1010_v41 = vpack.c.bf16 %v2064_v40, %v2064_v40 }
0x1017   :  { %v994_v42 = vpop.permute.xlu1 %993 }
0x1018   :  { %v2068_v43 = vmul.f32 %v1701_v26, %v994_v42  ;;  %1013 = vrot.lane.b32.xlu0 %v1010_v41, %s1740_s23  ;;  %v1420_v41 = vld [vmem:[%s2239_s0 + $0x1e] sm:$0x3] }
0x101a   :  { %v1011_v44 = vpack.c.bf16 %v2068_v43, %v2068_v43 }
0x101c   :  { %1059 = vrot.lane.b32.xlu1 %v1011_v44, %s1740_s23 }
0x108a   :  { %v1014_v45 = vpop.permute.xlu0 %1013 }
0x108b   :  { %1574 = vmatmul.mubr.msk.bf16.vlgmr.msra.gmra.mrb[24].mxu0 %vm50_vm2, %v1014_v45 }
0x108c   :  { %1586 = vmatpush3.bf16.msra.mxu0 %v1772_v1  ;;  %1589 = vmatprep.mubr.msk.bf16.mxu0 %vm1739_vm1, %v1738_v0  ;;  %v1411_v1 = vld [vmem:[%s2239_s0 + $0x18] sm:$0x3] }
0x108d   :  { %1587 = vmatprep.subr.bf16.mxu0 %v1738_v0 }
0x108e   :  { %v1060_v46 = vpop.permute.xlu1 %1059 }
0x108f   :  { %1582 = vmatmul.mubr.msk.bf16.vlgmr.msra.gmra.mrb[24].mxu1 %vm50_vm2, %v1060_v46 }
0x1090   :  { %1594 = vmatpush3.bf16.msra.mxu1 %v1786_v2  ;;  %1588 = vmatpush3.bf16.msra.mxu0 %v1796_v3  ;;  %v1412_v2 = vld [vmem:[%s2239_s0 + $0x1a] sm:$0x3]  ;;  %s1742_s0 = smov 96  }
0x1091   :  { %1595 = vmatprep.subr.bf16.mxu1 %v1738_v0  ;;  %1597 = vmatprep.mubr.msk.bf16.mxu1 %vm1739_vm1, %v1738_v0 }
0x1094   :  { %1596 = vmatpush3.bf16.msra.mxu1 %v1803_v4 }
0x115e   :  { %v1052_v47 = vpop.f32.mrb[24].mxu0 }
0x115f   :  { %v1107_v49 = vadd.f32 %v1411_v1, %v1052_v47  ;;  %v1575_v52 = vpop.f32.mrb[25].mxu0 }
0x1160   :  { %v1055_v53 = vpop.f32.mrb[26].mxu0 }
0x1161   :  { %1706 = vtanh.f32 %v1107_v49  ;;  %v1576_v3 = vpop.f32.mrb[27].mxu0  ;;  %v1413_v60 = vmul.f32 -1.442695, %v1107_v49 }
0x1162   :  { %v1098_v55 = vpop.f32.mrb[24].mxu1 }
0x1163   :  { %v1108_v56 = vadd.f32 %v1412_v2, %v1098_v55  ;;  %v1583_v57 = vpop.f32.mrb[25].mxu1 }
0x1164   :  { %v1101_v0 = vpop.f32.mrb[26].mxu1 }
0x1165   :  { %1708 = vtanh.f32 %v1108_v56  ;;  %v1584_v4 = vpop.f32.mrb[27].mxu1  ;;  %v1414_v61 = vmul.f32 -1.442695, %v1108_v56 }
0x1166   :  { %1710 = vpow2.f32 %v1413_v60 }
0x1167   :  { %1712 = vpow2.f32 %v1414_v61 }
0x116b   :  { %v1707_v58 = vpop.eup %1706 }
0x116c   :  { %1127 = vrot.lane.b32.xlu0 %v1707_v58, %s1741_s27 }
0x116f   :  { %v1709_v59 = vpop.eup %1708 }
0x1170   :  { %1129 = vrot.lane.b32.xlu1 %v1709_v59, %s1741_s27  ;;  %v1711_v63 = vpop.eup %1710 }
0x1171   :  { %v1115_v5 = vadd.f32 1.0, %v1711_v63  ;;  %v1713_v7 = vpop.eup %1712 }
0x1172   :  { %v1116_v8 = vadd.f32 1.0, %v1713_v7 }
0x1173   :  { %1714 = vrcp.f32 %v1115_v5 }
0x1174   :  { %1716 = vrcp.f32 %v1116_v8 }
0x117d   :  { %v1715_v9 = vpop.eup %1714 }
0x117e   :  { %v1717_v12 = vpop.eup %1716  ;;  %v1123_v15 = vmul.f32 %v1715_v9, %v2055_v32 }
0x117f   :  { %v1124_v20 = vmul.f32 %v1717_v12, %v2059_v36 }
0x11de   :  { %v1128_v10 = vpop.permute.xlu0 %1127 }
0x11df   :  { %v1133_v11 = vmul.f32 %v1715_v9, %v1128_v10 }
0x11e1   :  { %1137 = vrot.lane.b32.xlu0 %v1133_v11, %s1740_s23 }
0x11e2   :  { %v1130_v13 = vpop.permute.xlu1 %1129 }
0x11e3   :  { %v1134_v14 = vmul.f32 %v1717_v12, %v1130_v13 }
0x11e5   :  { %1139 = vrot.lane.b32.xlu1 %v1134_v14, %s1740_s23 }
0x1253   :  { %v1138_v17 = vpop.permute.xlu0 %1137 }
0x1254   :  { %v1143_v18 = vadd.f32 %v1138_v17, %v1123_v15 }
0x1256   :  { %1718 = vtanh.f32 %v1143_v18 }
0x1257   :  { %v1140_v21 = vpop.permute.xlu1 %1139 }
0x1258   :  { %v1144_v22 = vadd.f32 %v1140_v21, %v1124_v20 }
0x125a   :  { %1720 = vtanh.f32 %v1144_v22 }
0x1260   :  { %v1719_v23 = vpop.eup %1718 }
0x1261   :  { %1149 = vrot.lane.b32.xlu0 %v1719_v23, %s1741_s27 }
0x1264   :  { %v1721_v24 = vpop.eup %1720 }
0x1265   :  { %1151 = vrot.lane.b32.xlu1 %v1721_v24, %s1741_s27 }
0x12d3   :  { %v1150_v25 = vpop.permute.xlu0 %1149 }
0x12d4   :  { %v2100_v26 = vmul.f32 %v1715_v9, %v1150_v25 }
0x12d6   :  { %v1168_v27 = vpack.c.bf16 %v2100_v26, %v2100_v26 }
0x12d7   :  { %v1152_v28 = vpop.permute.xlu1 %1151 }
0x12d8   :  { %v2104_v29 = vmul.f32 %v1717_v12, %v1152_v28  ;;  %1171 = vrot.lane.b32.xlu0 %v1168_v27, %s1740_s23 }
0x12da   :  { %v1169_v30 = vpack.c.bf16 %v2104_v29, %v2104_v29 }
0x12dc   :  { %1217 = vrot.lane.b32.xlu1 %v1169_v30, %s1740_s23 }
0x134a   :  { %v1172_v32 = vpop.permute.xlu0 %1171 }
0x134b   :  { %1590 = vmatmul.mubr.msk.bf16.vlgmr.msra.gmra.mrb[28].mxu0 %vm50_vm2, %v1172_v32 }
0x134e   :  { %v1218_v33 = vpop.permute.xlu1 %1217 }
0x134f   :  { %1598 = vmatmul.mubr.msk.bf16.vlgmr.msra.gmra.mrb[28].mxu1 %vm50_vm2, %v1218_v33 }
0x141e   :  { %v1210_v36 = vpop.f32.mrb[28].mxu0 }
0x141f   :  { %v1265_v37 = vadd.f32 %v1419_v35, %v1210_v36  ;;  %v1591_v38 = vpop.f32.mrb[29].mxu0 }
0x1420   :  { %v1213_v39 = vpop.f32.mrb[30].mxu0 }
0x1421   :  { %1722 = vtanh.f32 %v1265_v37  ;;  %v1592_v42 = vpop.f32.mrb[31].mxu0  ;;  %v1421_v53 = vmul.f32 -1.442695, %v1265_v37 }
0x1422   :  { %v1256_v44 = vpop.f32.mrb[28].mxu1 }
0x1423   :  { %v1266_v45 = vadd.f32 %v1420_v41, %v1256_v44  ;;  %v1599_v46 = vpop.f32.mrb[29].mxu1 }
0x1424   :  { %v1259_v1 = vpop.f32.mrb[30].mxu1 }
0x1425   :  { %1724 = vtanh.f32 %v1266_v45  ;;  %v1600_v47 = vpop.f32.mrb[31].mxu1  ;;  %v1422_v2 = vmul.f32 -1.442695, %v1266_v45 }
0x1426   :  { %1726 = vpow2.f32 %v1421_v53 }
0x1427   :  { %1728 = vpow2.f32 %v1422_v2 }
0x142b   :  { %v1723_v49 = vpop.eup %1722 }
0x142c   :  { %1285 = vrot.lane.b32.xlu0 %v1723_v49, %s1741_s27 }
0x142f   :  { %v1725_v52 = vpop.eup %1724 }
0x1430   :  { %1287 = vrot.lane.b32.xlu1 %v1725_v52, %s1741_s27  ;;  %v1727_v3 = vpop.eup %1726 }
0x1431   :  { %v1273_v55 = vadd.f32 1.0, %v1727_v3  ;;  %v1729_v56 = vpop.eup %1728 }
0x1432   :  { %v1274_v57 = vadd.f32 1.0, %v1729_v56 }
0x1433   :  { %1730 = vrcp.f32 %v1273_v55 }
0x1434   :  { %1732 = vrcp.f32 %v1274_v57 }
0x143d   :  { %v1731_v0 = vpop.eup %1730 }
0x143e   :  { %v1733_v59 = vpop.eup %1732  ;;  %v1281_v63 = vmul.f32 %v1731_v0, %v1143_v18 }
0x143f   :  { %v1282_v8 = vmul.f32 %v1733_v59, %v1144_v22 }
0x149e   :  { %v1286_v4 = vpop.permute.xlu0 %1285 }
0x149f   :  { %v1291_v58 = vmul.f32 %v1731_v0, %v1286_v4 }
0x14a1   :  { %1295 = vrot.lane.b32.xlu0 %v1291_v58, %s1740_s23 }
0x14a2   :  { %v1288_v60 = vpop.permute.xlu1 %1287 }
0x14a3   :  { %v1292_v61 = vmul.f32 %v1733_v59, %v1288_v60 }
0x14a5   :  { %1297 = vrot.lane.b32.xlu1 %v1292_v61, %s1740_s23 }
0x1513   :  { %v1296_v5 = vpop.permute.xlu0 %1295 }
0x1514   :  { %v1301_v7 = vadd.f32 %v1296_v5, %v1281_v63 }
0x1516   :  { %1734 = vtanh.f32 %v1301_v7 }
0x1517   :  { %v1298_v9 = vpop.permute.xlu1 %1297 }
0x1518   :  { %v1302_v10 = vadd.f32 %v1298_v9, %v1282_v8 }
0x151a   :  { %1736 = vtanh.f32 %v1302_v10 }
0x1520   :  { %v1735_v11 = vpop.eup %1734 }
0x1521   :  { %1307 = vrot.lane.b32.xlu0 %v1735_v11, %s1741_s27 }
0x1524   :  { %v1737_v12 = vpop.eup %1736 }
0x1525   :  { %1309 = vrot.lane.b32.xlu1 %v1737_v12, %s1741_s27  ;;  %1330 = vrot.lane.b32.xlu0 %v1301_v7, %s1742_s0 }
0x1529   :  { %1332 = vrot.lane.b32.xlu1 %v1302_v10, %s1742_s0  ;;  %211 = vrot.lane.b32.xlu0 %v1844_v48, %s1740_s23 }
0x152d   :  { %213 = vrot.lane.b32.xlu1 %v1848_v51, %s1740_s23  ;;  %369 = vrot.lane.b32.xlu0 %v1888_v31, %s1740_s23 }
0x1531   :  { %371 = vrot.lane.b32.xlu1 %v1892_v34, %s1740_s23  ;;  %527 = vrot.lane.b32.xlu0 %v1932_v16, %s1740_s23 }
0x1535   :  { %529 = vrot.lane.b32.xlu1 %v1936_v19, %s1740_s23  ;;  %685 = vrot.lane.b32.xlu0 %v1976_v62, %s1740_s23 }
0x1539   :  { %687 = vrot.lane.b32.xlu1 %v1980_v6, %s1740_s23  ;;  %843 = vrot.lane.b32.xlu0 %v2020_v50, %s1740_s23 }
0x153d   :  { %845 = vrot.lane.b32.xlu1 %v2024_v54, %s1740_s23 }
0x1593   :  { %v1308_v48 = vpop.permute.xlu0 %1307 }
0x1594   :  { %v1313_v51 = vmul.f32 %v1731_v0, %v1308_v48 }
0x1596   :  { %1317 = vrot.lane.b32.xlu0 %v1313_v51, %s1740_s23 }
0x1597   :  { %v1310_v31 = vpop.permute.xlu1 %1309  ;;  %v1331_v34 = vpop.permute.xlu0 %1330 }
0x1598   :  { %v1314_v16 = vmul.f32 %v1733_v59, %v1310_v31  ;;  %1336 = vst.msk [vmem:[#allocation3] sm:$0x3] %vm19_vm0, %v1331_v34 }
0x159a   :  { %1319 = vrot.lane.b32.xlu1 %v1314_v16, %s1740_s23  ;;  %1001 = vrot.lane.b32.xlu0 %v2064_v40, %s1740_s23 }
0x159b   :  { %v1333_v19 = vpop.permute.xlu1 %1332  ;;  %v212_v62 = vpop.permute.xlu0 %211 }
0x159c   :  { %1337 = vst.msk [vmem:[#allocation3 + $0x2] sm:$0x3] %vm19_vm0, %v1333_v19  ;;  %218 = vst.msk [vmem:[%s2240_s2] sm:$0x3] %vm19_vm0, %v212_v62 }
0x159e   :  { %1003 = vrot.lane.b32.xlu1 %v2068_v43, %s1740_s23  ;;  %1159 = vrot.lane.b32.xlu0 %v2100_v26, %s1740_s23 }
0x159f   :  { %v1345_v6 = vld [vmem:[#allocation3] sm:$0x3]  ;;  %v214_v50 = vpop.permute.xlu1 %213  ;;  %v370_v54 = vpop.permute.xlu0 %369 }
0x15a0   :  { %1347 = vst.msk [vmem:[%s2241_s4] sm:$0x3] %vm19_vm0, %v1345_v6  ;;  %219 = vst.msk [vmem:[%s2240_s2 + $0x2] sm:$0x3] %vm19_vm0, %v214_v50 }
0x15a1   :  { %1375 = vst.msk [vmem:[%s2240_s2 + $0x4] sm:$0x3] %vm19_vm0, %v370_v54 }
0x15a2   :  { %1161 = vrot.lane.b32.xlu1 %v2104_v29, %s1740_s23 }
0x15a3   :  { %v1346_v40 = vld [vmem:[#allocation3 + $0x2] sm:$0x3]  ;;  %v372_v43 = vpop.permute.xlu1 %371  ;;  %v528_v13 = vpop.permute.xlu0 %527 }
0x15a4   :  { %1348 = vst.msk [vmem:[%s2241_s4 + $0x2] sm:$0x3] %vm19_vm0, %v1346_v40  ;;  %1376 = vst.msk [vmem:[%s2240_s2 + $0x6] sm:$0x3] %vm19_vm0, %v372_v43 }
0x15a5   :  { %1383 = vst.msk [vmem:[%s2240_s2 + $0x8] sm:$0x3] %vm19_vm0, %v528_v13 }
0x15a7   :  { %v530_v14 = vpop.permute.xlu1 %529  ;;  %v686_v15 = vpop.permute.xlu0 %685 }
0x15a8   :  { %1384 = vst.msk [vmem:[%s2240_s2 + $0xa] sm:$0x3] %vm19_vm0, %v530_v14  ;;  %1391 = vst.msk [vmem:[%s2240_s2 + $0xc] sm:$0x3] %vm19_vm0, %v686_v15 }
0x15ab   :  { %v688_v17 = vpop.permute.xlu1 %687  ;;  %v844_v18 = vpop.permute.xlu0 %843 }
0x15ac   :  { %1392 = vst.msk [vmem:[%s2240_s2 + $0xe] sm:$0x3] %vm19_vm0, %v688_v17  ;;  %1399 = vst.msk [vmem:[%s2240_s2 + $0x10] sm:$0x3] %vm19_vm0, %v844_v18 }
0x15af   :  { %v846_v20 = vpop.permute.xlu1 %845 }
0x15b0   :  { %1400 = vst.msk [vmem:[%s2240_s2 + $0x12] sm:$0x3] %vm19_vm0, %v846_v20 }
0x1608   :  { %v1318_v21 = vpop.permute.xlu0 %1317 }
0x1609   :  { %1423 = vst.msk [vmem:[%s2240_s2 + $0x1c] sm:$0x3] %vm19_vm0, %v1318_v21  ;;  %1326 = vst.msk [vmem:[#allocation2] sm:$0x3] %vm19_vm0, %v1318_v21 }
0x160c   :  { %v1320_v22 = vpop.permute.xlu1 %1319  ;;  %v1002_v23 = vpop.permute.xlu0 %1001 }
0x160d   :  { %1424 = vst.msk [vmem:[%s2240_s2 + $0x1e] sm:$0x3] %vm19_vm0, %v1320_v22  ;;  %1327 = vst.msk [vmem:[#allocation2 + $0x2] sm:$0x3] %vm19_vm0, %v1320_v22 }
0x160e   :  { %1407 = vst.msk [vmem:[%s2240_s2 + $0x14] sm:$0x3] %vm19_vm0, %v1002_v23 }
0x1610   :  { %v1341_v24 = vld [vmem:[#allocation2] sm:$0x3]  ;;  %v1004_v25 = vpop.permute.xlu1 %1003  ;;  %v1160_v26 = vpop.permute.xlu0 %1159 }
0x1611   :  { %1343 = vst.msk [vmem:[%s2242_s3] sm:$0x3] %vm19_vm0, %v1341_v24  ;;  %1408 = vst.msk [vmem:[%s2240_s2 + $0x16] sm:$0x3] %vm19_vm0, %v1004_v25 }
0x1612   :  { %1415 = vst.msk [vmem:[%s2240_s2 + $0x18] sm:$0x3] %vm19_vm0, %v1160_v26 }
0x1614   :  { %v1342_v27 = vld [vmem:[#allocation2 + $0x2] sm:$0x3]  ;;  %v1162_v28 = vpop.permute.xlu1 %1161 }
0x1615   :  { %1344 = vst.msk [vmem:[%s2242_s3 + $0x2] sm:$0x3] %vm19_vm0, %v1342_v27  ;;  %1416 = vst.msk [vmem:[%s2240_s2 + $0x1a] sm:$0x3] %vm19_vm0, %v1162_v28 }

</bundles_post_ra>
